<compile_context>
chip_gen: v7x
topology: tpu7x:2x2x1
jax: 0.10.0
libtpu: 0.0.40
codegen_flags: <defaults>
</compile_context>

<pallas_src>
import functools
import math

import jax
import jax.numpy as jnp
from jax import lax
from jax.experimental import pallas as pl
from jax.experimental.pallas import tpu as pltpu

INV_SQRT2 = 0.7071067811865476
LN_EPS = 1e-6   # RelationalTransformer: norm_layer = partial(nn.LayerNorm, eps=1e-06)


def _layernorm(x, w, b, eps=LN_EPS):
    mu = jnp.mean(x, axis=-1, keepdims=True)
    xc = x - mu
    var = jnp.mean(xc * xc, axis=-1, keepdims=True)
    return xc * lax.rsqrt(var + eps) * w + b


def _gelu_exact(x):
    # nn.GELU default (erf based, exact)
    return 0.5 * x * (1.0 + lax.erf(x * INV_SQRT2))


# ----------------------------- fused Pallas kernel -----------------------------

def fused_transformer_kernel(
    # resident inputs (same block for every grid step)
    xs_ref,            # (2, TB, D)   xs[0]=x1 rows, xs[1]=x2 rows
    proj_w_ref,        # (D, E)       mm dtype
    proj_b_ref,        # (1, E)       f32
    cls_ref,           # (1, E)       f32
    head_pool_ref,     # (E, H)       f32, one-hot(head) * 1/sqrt(dh)
    head_expand_ref,   # (H, E)       f32, one-hot(head)
    final_ln_ref,      # (2, E)       [norm_w; norm_b]
    head_w_ref,        # (E, C)       mm dtype
    head_b_ref,        # (1, C)       f32
    # per-layer streamed inputs (block index = depth step d)
    ln_ref,            # (4, E)       [ln1_w; ln1_b; ln2_w; ln2_b]
    wq_ref, wk_ref, wv_ref, wo_ref,   # (E, E) each, mm dtype
    wfc1_ref,          # (E, Hd)      mm dtype
    wfc2_ref,          # (Hd, E)      mm dtype
    be_ref,            # (5, E)       [b_q; b_k; b_v; b_o; b_fc2]
    bfc1_ref,          # (1, Hd)
    # output
    out_ref,           # (TB, C)
    # scratch
    tok_ref,           # (3*TB, E) f32, resident across depth steps
    *, tb, mm_dtype):
    d = pl.program_id(1)

    def mm(a, w_ref):
        # bf16 (or f32) MXU inputs, f32 accumulation.
        return jnp.dot(a.astype(mm_dtype), w_ref[...].astype(mm_dtype),
                       preferred_element_type=jnp.float32)

    # ---- step 0: input projection + cls token -> token slab ----
    @pl.when(d == 0)
    def _embed():
        xcat = jnp.concatenate([xs_ref[0], xs_ref[1]], axis=0)      # (2*TB, D)
        proj = mm(xcat, proj_w_ref) + proj_b_ref[...]               # (2*TB, E)
        cls = cls_ref[...]
        tok_ref[0:tb, :] = jnp.broadcast_to(cls, (tb, cls.shape[-1]))
        tok_ref[tb:, :] = proj

    x = tok_ref[...]                                                # (3*TB, E) f32
    ln = ln_ref[...]
    be = be_ref[...]

    # ---- multi-head self attention over the whole batch slab ----
    h = _layernorm(x, ln[0:1, :], ln[1:2, :])
    q = mm(h, wq_ref) + be[0:1, :]
    k = mm(h, wk_ref) + be[1:2, :]
    v = mm(h, wv_ref) + be[2:3, :]

    pool = head_pool_ref[...]        # (E, H), 1/sqrt(dh) folded in (applied once)
    expand = head_expand_ref[...]    # (H, E)
    ks = (k[0:tb], k[tb:2 * tb], k[2 * tb:3 * tb])
    vs = (v[0:tb], v[tb:2 * tb], v[2 * tb:3 * tb])

    def attend(qi):                  # qi: (TB, E) queries of one token position
        # per-head scores against the 3 key tokens: (q*k) pooled per head
        s = [jnp.dot(qi * kj, pool, preferred_element_type=jnp.float32)
             for kj in ks]                                           # 3 x (TB, H)
        m = jnp.maximum(jnp.maximum(s[0], s[1]), s[2])
        e = [jnp.exp(sj - m) for sj in s]
        inv = 1.0 / (e[0] + e[1] + e[2])
        out = jnp.zeros_like(qi)
        for ej, vj in zip(e, vs):
            p = jnp.dot(ej * inv, expand,
                        preferred_element_type=jnp.float32)          # (TB, E)
            out = out + p * vj
        return out                                                   # (TB, E)

    attn = jnp.concatenate(
        [attend(q[0:tb]), attend(q[tb:2 * tb]), attend(q[2 * tb:3 * tb])], axis=0)
    x = x + mm(attn, wo_ref) + be[3:4, :]                            # drop_path=0

    # ---- MLP ----
    h2 = _layernorm(x, ln[2:3, :], ln[3:4, :])
    m1 = _gelu_exact(mm(h2, wfc1_ref) + bfc1_ref[...])
    x = x + mm(m1, wfc2_ref) + be[4:5, :]

    tok_ref[...] = x

    # ---- last step: final LayerNorm on cls rows + classification head ----
    @pl.when(d == pl.num_programs(1) - 1)
    def _head():
        f = _layernorm(x[0:tb, :], final_ln_ref[0:1, :], final_ln_ref[1:2, :])
        out_ref[...] = mm(f, head_w_ref) + head_b_ref[...]


# ----------------------------- wrapper -----------------------------

def relational_transformer_forward(x, params, num_heads,
                                   mm_dtype=jnp.bfloat16, batch_tile=None):
    """Equivalent of RelationalTransformer.forward(x) (default flags)."""
    B = x.shape[0]
    D, E = params["proj_w"].shape
    blocks = params["blocks"]
    depth = len(blocks)
    C = params["head_w"].shape[1]
    hidden = blocks[0]["w_fc1"].shape[1]
    H = num_heads
    dh = E // H

    # Whole batch per grid step here (B is tiny).  For large B pick a divisor
    # with 3*TB >= 128 rows and size it against v7x's 64 MiB VMEM.
    tb = B if batch_tile is None else batch_tile
    assert B % tb == 0

    # torch.chunk(x, 2, dim=1) -> token-major input slab (2, B, D)
    xs = jnp.stack([x[:, :D], x[:, D:]], axis=0)

    # per-head pool / broadcast constants; 1/sqrt(dh) folded into the pool once
    lane_head = jnp.arange(E, dtype=jnp.int32) // dh
    hid = jnp.arange(H, dtype=jnp.int32)
    head_pool = (lane_head[:, None] == hid[None, :]).astype(jnp.float32) / math.sqrt(dh)
    head_expand = (hid[:, None] == lane_head[None, :]).astype(jnp.float32)

    final_ln = jnp.concatenate([params["norm_w"], params["norm_b"]], axis=0)   # (2, E)

    # ---- stack per-layer weights along a leading depth axis ----
    def stack(name):
        return jnp.stack([bp[name] for bp in blocks], axis=0)

    ln_p = jnp.stack(
        [jnp.concatenate([bp["ln1_w"], bp["ln1_b"], bp["ln2_w"], bp["ln2_b"]], axis=0)
         for bp in blocks], axis=0)                                  # (depth, 4, E)
    w_qkv = stack("w_qkv")                                           # (depth, E, 3E)
    w_q = w_qkv[:, :, :E].astype(mm_dtype)
    w_k = w_qkv[:, :, E:2 * E].astype(mm_dtype)
    w_v = w_qkv[:, :, 2 * E:].astype(mm_dtype)
    w_o = stack("w_o").astype(mm_dtype)
    w_fc1 = stack("w_fc1").astype(mm_dtype)
    w_fc2 = stack("w_fc2").astype(mm_dtype)
    bias_e = jnp.stack(
        [jnp.concatenate([bp["b_qkv"].reshape(3, E),
                          bp["b_o"].reshape(1, E),
                          bp["b_fc2"].reshape(1, E)], axis=0)
         for bp in blocks], axis=0)                                  # (depth, 5, E)
    b_fc1 = stack("b_fc1")                                           # (depth, 1, hidden)

    proj_w = params["proj_w"].astype(mm_dtype)
    head_w = params["head_w"].astype(mm_dtype)

    def res(shape):
        return pl.BlockSpec(shape, lambda b, d, _s=shape: (0,) * len(_s))

    def per_layer(tail):
        return pl.BlockSpec((None,) + tail,
                            lambda b, d, _t=tail: (d,) + (0,) * len(_t))

    in_specs = [
        pl.BlockSpec((2, tb, D), lambda b, d: (0, b, 0)),            # xs
        res((D, E)),           # proj_w
        res((1, E)),           # proj_b
        res((1, E)),           # cls
        res((E, H)),           # head_pool
        res((H, E)),           # head_expand
        res((2, E)),           # final_ln
        res((E, C)),           # head_w
        res((1, C)),           # head_b
        per_layer((4, E)),     # ln_p
        per_layer((E, E)),     # w_q
        per_layer((E, E)),     # w_k
        per_layer((E, E)),     # w_v
        per_layer((E, E)),     # w_o
        per_layer((E, hidden)),  # w_fc1
        per_layer((hidden, E)),  # w_fc2
        per_layer((5, E)),     # bias_e
        per_layer((1, hidden)),  # b_fc1
    ]
    out_spec = pl.BlockSpec((tb, C), lambda b, d: (b, 0))

    return pl.pallas_call(
        functools.partial(fused_transformer_kernel, tb=tb, mm_dtype=mm_dtype),
        out_shape=jax.ShapeDtypeStruct((B, C), jnp.float32),
        grid_spec=pltpu.PrefetchScalarGridSpec(
            num_scalar_prefetch=0,
            grid=(B // tb, depth),
            in_specs=in_specs,
            out_specs=out_spec,
            scratch_shapes=[pltpu.VMEM((3 * tb, E), jnp.float32)]),
        compiler_params=pltpu.CompilerParams(
            dimension_semantics=("parallel", "arbitrary"),
            vmem_limit_bytes=32 * 1024 * 1024),
    )(xs, proj_w, params["proj_b"], params["cls"], head_pool, head_expand,
      final_ln, head_w, params["head_b"],
      ln_p, w_q, w_k, w_v, w_o, w_fc1, w_fc2, bias_e, b_fc1)


# ----------------------------- params & reference -----------------------------

def init_params(key, input_dim, embed_dim, depth, num_heads, mlp_ratio, num_classes):
    keys = jax.random.split(key, 3 + depth)

    def dense(k, fan_in, fan_out):
        return jax.random.normal(k, (fan_in, fan_out), jnp.float32) * 0.02

    hidden = int(embed_dim * mlp_ratio)
    params = {
        "cls": jax.random.normal(keys[0], (1, embed_dim), jnp.float32) * 0.02,
        "proj_w": dense(keys[1], input_dim, embed_dim),
        "proj_b": jnp.zeros((1, embed_dim), jnp.float32),
        "norm_w": jnp.ones((1, embed_dim), jnp.float32),
        "norm_b": jnp.zeros((1, embed_dim), jnp.float32),
        "head_w": dense(keys[2], embed_dim, num_classes),
        "head_b": jnp.zeros((1, num_classes), jnp.float32),
        "blocks": [],
    }
    for i in range(depth):
        bk = jax.random.split(keys[3 + i], 4)
        params["blocks"].append(dict(
            ln1_w=jnp.ones((1, embed_dim), jnp.float32),
            ln1_b=jnp.zeros((1, embed_dim), jnp.float32),
            w_qkv=dense(bk[0], embed_dim, 3 * embed_dim),
            b_qkv=jnp.zeros((1, 3 * embed_dim), jnp.float32),
            w_o=dense(bk[1], embed_dim, embed_dim),
            b_o=jnp.zeros((1, embed_dim), jnp.float32),
            ln2_w=jnp.ones((1, embed_dim), jnp.float32),
            ln2_b=jnp.zeros((1, embed_dim), jnp.float32),
            w_fc1=dense(bk[2], embed_dim, hidden),
            b_fc1=jnp.zeros((1, hidden), jnp.float32),
            w_fc2=dense(bk[3], hidden, embed_dim),
            b_fc2=jnp.zeros((1, embed_dim), jnp.float32),
        ))
    return params


def reference_forward(x, params, num_heads, mm_dtype=jnp.float32):
    """Pure-JAX reference mirroring the PyTorch forward.  mm_dtype selects the
    matmul-input precision (f32 accumulation), matching the kernel's casts."""
    def rmm(a, w):
        return jnp.dot(a.astype(mm_dtype), w.astype(mm_dtype),
                       preferred_element_type=jnp.float32)

    B = x.shape[0]
    D, E = params["proj_w"].shape
    dh = E // num_heads
    scale = 1.0 / math.sqrt(dh)
    y1 = rmm(x[:, :D], params["proj_w"]) + params["proj_b"]
    y2 = rmm(x[:, D:], params["proj_w"]) + params["proj_b"]
    cls = jnp.broadcast_to(params["cls"], (B, E))
    t = jnp.stack([cls, y1, y2], axis=1)                             # (B, 3, E)
    N = t.shape[1]
    for bp in params["blocks"]:
        h = _layernorm(t, bp["ln1_w"], bp["ln1_b"])
        qkv = rmm(h, bp["w_qkv"]) + bp["b_qkv"]
        q, k, v = qkv[..., :E], qkv[..., E:2 * E], qkv[..., 2 * E:]
        q = q.reshape(B, N, num_heads, dh).transpose(0, 2, 1, 3)
        k = k.reshape(B, N, num_heads, dh).transpose(0, 2, 1, 3)
        v = v.reshape(B, N, num_heads, dh).transpose(0, 2, 1, 3)
        s = jnp.einsum("bhnd,bhmd->bhnm", q, k) * scale
        p = jax.nn.softmax(s, axis=-1)
        o = jnp.einsum("bhnm,bhmd->bhnd", p, v).transpose(0, 2, 1, 3).reshape(B, N, E)
        t = t + (rmm(o, bp["w_o"]) + bp["b_o"])
        h2 = _layernorm(t, bp["ln2_w"], bp["ln2_b"])
        m = rmm(_gelu_exact(rmm(h2, bp["w_fc1"]) + bp["b_fc1"]), bp["w_fc2"]) + bp["b_fc2"]
        t = t + m
    f = _layernorm(t[:, 0], params["norm_w"], params["norm_b"])
    return rmm(f, params["head_w"]) + params["head_b"]


if __name__ == "__main__":
    B = 2
    input_dim = 16
    embed_dim = 32
    depth = 2
    num_heads = 4
    mlp_ratio = 4
    num_classes = 1

    key = jax.random.PRNGKey(0)
    kx, kp = jax.random.split(key)
    x = jax.random.normal(kx, (B, 2 * input_dim), jnp.float32)
    params = init_params(kp, input_dim, embed_dim, depth, num_heads,
                         mlp_ratio, num_classes)

    # f32 matmul path: tight check against the f32 reference
    out_f32 = jax.block_until_ready(
        relational_transformer_forward(x, params, num_heads, mm_dtype=jnp.float32))
    ref_f32 = reference_forward(x, params, num_heads, mm_dtype=jnp.float32)
    assert out_f32.shape == (B, num_classes), out_f32.shape
    assert jnp.allclose(out_f32, ref_f32, atol=1e-3, rtol=1e-3), (out_f32, ref_f32)

    # bf16 MXU-input path (v6e/v7x recommendation): tight check against a
    # matched-precision reference, loose sanity check against the f32 reference
    out_bf16 = jax.block_until_ready(
        relational_transformer_forward(x, params, num_heads, mm_dtype=jnp.bfloat16))
    ref_bf16 = reference_forward(x, params, num_heads, mm_dtype=jnp.bfloat16)
    assert jnp.allclose(out_bf16, ref_bf16, atol=1e-3, rtol=1e-3), (out_bf16, ref_bf16)
    assert jnp.allclose(out_bf16, ref_f32, atol=5e-2, rtol=5e-2), (out_bf16, ref_f32)

    # TODO(synk): return_attention / return_feats variants are not implemented
    # (default forward path only); dropout / drop-path are p=0 -> identity.
    print("KERNEL_OK")
</pallas_src>

<mosaic_0001>
module attributes {stable_mosaic.version = 11 : i64} {
  func.func @fused_transformer_kernel(%arg0: i32, %arg1: i32, %arg2: memref<2x2x16xf32, #tpu.memory_space<vmem>>, %arg3: memref<16x32xf32, #tpu.memory_space<vmem>>, %arg4: memref<1x32xf32, #tpu.memory_space<vmem>>, %arg5: memref<1x32xf32, #tpu.memory_space<vmem>>, %arg6: memref<32x4xf32, #tpu.memory_space<vmem>>, %arg7: memref<4x32xf32, #tpu.memory_space<vmem>>, %arg8: memref<2x32xf32, #tpu.memory_space<vmem>>, %arg9: memref<32x1xf32, #tpu.memory_space<vmem>>, %arg10: memref<1x1xf32, #tpu.memory_space<vmem>>, %arg11: memref<1x4x32xf32, #tpu.memory_space<vmem>>, %arg12: memref<1x32x32xf32, #tpu.memory_space<vmem>>, %arg13: memref<1x32x32xf32, #tpu.memory_space<vmem>>, %arg14: memref<1x32x32xf32, #tpu.memory_space<vmem>>, %arg15: memref<1x32x32xf32, #tpu.memory_space<vmem>>, %arg16: memref<1x32x128xf32, #tpu.memory_space<vmem>>, %arg17: memref<1x128x32xf32, #tpu.memory_space<vmem>>, %arg18: memref<1x5x32xf32, #tpu.memory_space<vmem>>, %arg19: memref<1x1x128xf32, #tpu.memory_space<vmem>>, %arg20: memref<2x1xf32, #tpu.memory_space<vmem>>, %arg21: memref<6x32xf32, #tpu.memory_space<vmem>>) attributes {dimension_semantics = [#tpu.dimension_semantics<parallel>, #tpu.dimension_semantics<arbitrary>], iteration_bounds = array<i64: 1, 2>, scalar_prefetch = 0 : i64, scratch_operands = 1 : i64, tpu.core_type = #tpu.core_type<tc>, window_params = [{transform_indices = @transform_0, window_bounds = array<i64: 2, 2, 16>}, {pipeline_mode = #tpu.pipeline_mode<synchronous>, transform_indices = @transform_1, window_bounds = array<i64: 16, 32>}, {pipeline_mode = #tpu.pipeline_mode<synchronous>, transform_indices = @transform_2, window_bounds = array<i64: 1, 32>}, {pipeline_mode = #tpu.pipeline_mode<synchronous>, transform_indices = @transform_3, window_bounds = array<i64: 1, 32>}, {pipeline_mode = #tpu.pipeline_mode<synchronous>, transform_indices = @transform_4, window_bounds = array<i64: 32, 4>}, {pipeline_mode = #tpu.pipeline_mode<synchronous>, transform_indices = @transform_5, window_bounds = array<i64: 4, 32>}, {pipeline_mode = #tpu.pipeline_mode<synchronous>, transform_indices = @transform_6, window_bounds = array<i64: 2, 32>}, {pipeline_mode = #tpu.pipeline_mode<synchronous>, transform_indices = @transform_7, window_bounds = array<i64: 32, 1>}, {pipeline_mode = #tpu.pipeline_mode<synchronous>, transform_indices = @transform_8, window_bounds = array<i64: 1, 1>}, {transform_indices = @transform_9, window_bounds = array<i64: 1, 4, 32>}, {transform_indices = @transform_10, window_bounds = array<i64: 1, 32, 32>}, {transform_indices = @transform_11, window_bounds = array<i64: 1, 32, 32>}, {transform_indices = @transform_12, window_bounds = array<i64: 1, 32, 32>}, {transform_indices = @transform_13, window_bounds = array<i64: 1, 32, 32>}, {transform_indices = @transform_14, window_bounds = array<i64: 1, 32, 128>}, {transform_indices = @transform_15, window_bounds = array<i64: 1, 128, 32>}, {transform_indices = @transform_16, window_bounds = array<i64: 1, 5, 32>}, {transform_indices = @transform_17, window_bounds = array<i64: 1, 1, 128>}, {transform_indices = @transform_18, window_bounds = array<i64: 2, 1>}]} {
    %c0_i32 = arith.constant 0 : i32
    %0 = arith.cmpi eq, %arg1, %c0_i32 : i32
    %1 = arith.extui %0 : i1 to i32
    %c0_i32_0 = arith.constant 0 : i32
    %2 = arith.cmpi ne, %1, %c0_i32_0 : i32
    scf.if %2 {
      %c0_78 = arith.constant 0 : index
      %c0_79 = arith.constant 0 : index
      %c0_80 = arith.constant 0 : index
      %208 = vector.load %arg2[%c0_78, %c0_79, %c0_80] : memref<2x2x16xf32, #tpu.memory_space<vmem>>, vector<1x2x16xf32>
      %209 = vector.shape_cast %208 : vector<1x2x16xf32> to vector<2x16xf32>
      %c1 = arith.constant 1 : index
      %c0_81 = arith.constant 0 : index
      %c0_82 = arith.constant 0 : index
      %210 = vector.load %arg2[%c1, %c0_81, %c0_82] : memref<2x2x16xf32, #tpu.memory_space<vmem>>, vector<1x2x16xf32>
      %211 = vector.shape_cast %210 : vector<1x2x16xf32> to vector<2x16xf32>
      %212 = tpu.concatenate %209, %211 in 0 : vector<2x16xf32>, vector<2x16xf32> -> vector<4x16xf32>
      %c0_83 = arith.constant 0 : index
      %c0_84 = arith.constant 0 : index
      %213 = vector.load %arg3[%c0_83, %c0_84] : memref<16x32xf32, #tpu.memory_space<vmem>>, vector<16x32xf32>
      %cst_85 = arith.constant dense<0.000000e+00> : vector<4x32xf32>
      %214 = tpu.matmul %212, %213, %cst_85 {dimension_numbers = #tpu.dot_dimension_numbers<[1], [0], [0], [1], [0, 0, 1, 1], [], []>} : vector<4x16xf32>, vector<16x32xf32>, vector<4x32xf32> -> vector<4x32xf32>
      %c0_86 = arith.constant 0 : index
      %c0_87 = arith.constant 0 : index
      %215 = vector.load %arg4[%c0_86, %c0_87] : memref<1x32xf32, #tpu.memory_space<vmem>>, vector<1x32xf32>
      %216 = vector.broadcast %215 : vector<1x32xf32> to vector<4x32xf32>
      %217 = arith.addf %214, %216 : vector<4x32xf32>
      %c0_88 = arith.constant 0 : index
      %c0_89 = arith.constant 0 : index
      %218 = vector.load %arg5[%c0_88, %c0_89] : memref<1x32xf32, #tpu.memory_space<vmem>>, vector<1x32xf32>
      %219 = vector.shape_cast %218 : vector<1x32xf32> to vector<1x32xf32>
      %220 = vector.broadcast %219 : vector<1x32xf32> to vector<2x32xf32>
      %c0_90 = arith.constant 0 : index
      %c0_91 = arith.constant 0 : index
      %221 = vector.load %arg21[%c0_90, %c0_91] : memref<6x32xf32, #tpu.memory_space<vmem>>, vector<2x32xf32>
      tpu.vector_store %arg21[%c0_90, %c0_91], %220 {strides = array<i32>} : memref<6x32xf32, #tpu.memory_space<vmem>>, vector<2x32xf32>,
      %c2 = arith.constant 2 : index
      %c0_92 = arith.constant 0 : index
      %222 = vector.load %arg21[%c2, %c0_92] : memref<6x32xf32, #tpu.memory_space<vmem>>, vector<4x32xf32>
      tpu.vector_store %arg21[%c2, %c0_92], %217 {strides = array<i32>} : memref<6x32xf32, #tpu.memory_space<vmem>>, vector<4x32xf32>,
    } else {
    }
    %c0 = arith.constant 0 : index
    %c0_1 = arith.constant 0 : index
    %3 = vector.load %arg21[%c0, %c0_1] : memref<6x32xf32, #tpu.memory_space<vmem>>, vector<6x32xf32>
    %c0_2 = arith.constant 0 : index
    %c0_3 = arith.constant 0 : index
    %c0_4 = arith.constant 0 : index
    %4 = vector.load %arg11[%c0_2, %c0_3, %c0_4] : memref<1x4x32xf32, #tpu.memory_space<vmem>>, vector<1x4x32xf32>
    %5 = vector.shape_cast %4 : vector<1x4x32xf32> to vector<4x32xf32>
    %c0_5 = arith.constant 0 : index
    %c0_6 = arith.constant 0 : index
    %c0_7 = arith.constant 0 : index
    %6 = vector.load %arg18[%c0_5, %c0_6, %c0_7] : memref<1x5x32xf32, #tpu.memory_space<vmem>>, vector<1x5x32xf32>
    %7 = vector.shape_cast %6 : vector<1x5x32xf32> to vector<5x32xf32>
    %8 = vector.extract_strided_slice %5 {offsets = [0, 0], sizes = [1, 32], strides = [1, 1]} : vector<4x32xf32> to vector<1x32xf32>
    %9 = vector.extract_strided_slice %5 {offsets = [1, 0], sizes = [1, 32], strides = [1, 1]} : vector<4x32xf32> to vector<1x32xf32>
    %cst = arith.constant dense<0.000000e+00> : vector<6xf32>
    %10 = vector.multi_reduction <add>, %3, %cst [1] : vector<6x32xf32> to vector<6xf32>
    %11 = vector.shape_cast %10 : vector<6xf32> to vector<6x1xf32>
    %cst_8 = arith.constant 3.200000e+01 : f32
    %12 = vector.broadcast %cst_8 : f32 to vector<6x1xf32>
    %13 = arith.divf %11, %12 : vector<6x1xf32>
    %14 = vector.broadcast %13 : vector<6x1xf32> to vector<6x32xf32>
    %15 = arith.subf %3, %14 : vector<6x32xf32>
    %16 = arith.mulf %15, %15 : vector<6x32xf32>
    %cst_9 = arith.constant dense<0.000000e+00> : vector<6xf32>
    %17 = vector.multi_reduction <add>, %16, %cst_9 [1] : vector<6x32xf32> to vector<6xf32>
    %18 = vector.shape_cast %17 : vector<6xf32> to vector<6x1xf32>
    %cst_10 = arith.constant 3.200000e+01 : f32
    %19 = vector.broadcast %cst_10 : f32 to vector<6x1xf32>
    %20 = arith.divf %18, %19 : vector<6x1xf32>
    %cst_11 = arith.constant 9.99999997E-7 : f32
    %21 = vector.broadcast %cst_11 : f32 to vector<6x1xf32>
    %22 = arith.addf %20, %21 : vector<6x1xf32>
    %23 = math.rsqrt %22 : vector<6x1xf32>
    %24 = vector.broadcast %23 : vector<6x1xf32> to vector<6x32xf32>
    %25 = arith.mulf %15, %24 : vector<6x32xf32>
    %26 = vector.broadcast %8 : vector<1x32xf32> to vector<6x32xf32>
    %27 = arith.mulf %25, %26 : vector<6x32xf32>
    %28 = vector.broadcast %9 : vector<1x32xf32> to vector<6x32xf32>
    %29 = arith.addf %27, %28 : vector<6x32xf32>
    %c0_12 = arith.constant 0 : index
    %c0_13 = arith.constant 0 : index
    %c0_14 = arith.constant 0 : index
    %30 = vector.load %arg12[%c0_12, %c0_13, %c0_14] : memref<1x32x32xf32, #tpu.memory_space<vmem>>, vector<1x32x32xf32>
    %31 = vector.shape_cast %30 : vector<1x32x32xf32> to vector<32x32xf32>
    %cst_15 = arith.constant dense<0.000000e+00> : vector<6x32xf32>
    %32 = tpu.matmul %29, %31, %cst_15 {dimension_numbers = #tpu.dot_dimension_numbers<[1], [0], [0], [1], [0, 0, 1, 1], [], []>} : vector<6x32xf32>, vector<32x32xf32>, vector<6x32xf32> -> vector<6x32xf32>
    %33 = vector.extract_strided_slice %7 {offsets = [0, 0], sizes = [1, 32], strides = [1, 1]} : vector<5x32xf32> to vector<1x32xf32>
    %34 = vector.broadcast %33 : vector<1x32xf32> to vector<6x32xf32>
    %35 = arith.addf %32, %34 : vector<6x32xf32>
    %c0_16 = arith.constant 0 : index
    %c0_17 = arith.constant 0 : index
    %c0_18 = arith.constant 0 : index
    %36 = vector.load %arg13[%c0_16, %c0_17, %c0_18] : memref<1x32x32xf32, #tpu.memory_space<vmem>>, vector<1x32x32xf32>
    %37 = vector.shape_cast %36 : vector<1x32x32xf32> to vector<32x32xf32>
    %cst_19 = arith.constant dense<0.000000e+00> : vector<6x32xf32>
    %38 = tpu.matmul %29, %37, %cst_19 {dimension_numbers = #tpu.dot_dimension_numbers<[1], [0], [0], [1], [0, 0, 1, 1], [], []>} : vector<6x32xf32>, vector<32x32xf32>, vector<6x32xf32> -> vector<6x32xf32>
    %39 = vector.extract_strided_slice %7 {offsets = [1, 0], sizes = [1, 32], strides = [1, 1]} : vector<5x32xf32> to vector<1x32xf32>
    %40 = vector.broadcast %39 : vector<1x32xf32> to vector<6x32xf32>
    %41 = arith.addf %38, %40 : vector<6x32xf32>
    %c0_20 = arith.constant 0 : index
    %c0_21 = arith.constant 0 : index
    %c0_22 = arith.constant 0 : index
    %42 = vector.load %arg14[%c0_20, %c0_21, %c0_22] : memref<1x32x32xf32, #tpu.memory_space<vmem>>, vector<1x32x32xf32>
    %43 = vector.shape_cast %42 : vector<1x32x32xf32> to vector<32x32xf32>
    %cst_23 = arith.constant dense<0.000000e+00> : vector<6x32xf32>
    %44 = tpu.matmul %29, %43, %cst_23 {dimension_numbers = #tpu.dot_dimension_numbers<[1], [0], [0], [1], [0, 0, 1, 1], [], []>} : vector<6x32xf32>, vector<32x32xf32>, vector<6x32xf32> -> vector<6x32xf32>
    %45 = vector.extract_strided_slice %7 {offsets = [2, 0], sizes = [1, 32], strides = [1, 1]} : vector<5x32xf32> to vector<1x32xf32>
    %46 = vector.broadcast %45 : vector<1x32xf32> to vector<6x32xf32>
    %47 = arith.addf %44, %46 : vector<6x32xf32>
    %c0_24 = arith.constant 0 : index
    %c0_25 = arith.constant 0 : index
    %48 = vector.load %arg6[%c0_24, %c0_25] : memref<32x4xf32, #tpu.memory_space<vmem>>, vector<32x4xf32>
    %c0_26 = arith.constant 0 : index
    %c0_27 = arith.constant 0 : index
    %49 = vector.load %arg7[%c0_26, %c0_27] : memref<4x32xf32, #tpu.memory_space<vmem>>, vector<4x32xf32>
    %50 = vector.extract_strided_slice %41 {offsets = [0, 0], sizes = [2, 32], strides = [1, 1]} : vector<6x32xf32> to vector<2x32xf32>
    %51 = vector.extract_strided_slice %41 {offsets = [2, 0], sizes = [2, 32], strides = [1, 1]} : vector<6x32xf32> to vector<2x32xf32>
    %52 = vector.extract_strided_slice %41 {offsets = [4, 0], sizes = [2, 32], strides = [1, 1]} : vector<6x32xf32> to vector<2x32xf32>
    %53 = vector.extract_strided_slice %47 {offsets = [0, 0], sizes = [2, 32], strides = [1, 1]} : vector<6x32xf32> to vector<2x32xf32>
    %54 = vector.extract_strided_slice %47 {offsets = [2, 0], sizes = [2, 32], strides = [1, 1]} : vector<6x32xf32> to vector<2x32xf32>
    %55 = vector.extract_strided_slice %47 {offsets = [4, 0], sizes = [2, 32], strides = [1, 1]} : vector<6x32xf32> to vector<2x32xf32>
    %56 = vector.extract_strided_slice %35 {offsets = [0, 0], sizes = [2, 32], strides = [1, 1]} : vector<6x32xf32> to vector<2x32xf32>
    %57 = arith.mulf %56, %50 : vector<2x32xf32>
    %cst_28 = arith.constant dense<0.000000e+00> : vector<2x4xf32>
    %58 = tpu.matmul %57, %48, %cst_28 {dimension_numbers = #tpu.dot_dimension_numbers<[1], [0], [0], [1], [0, 0, 1, 1], [], []>} : vector<2x32xf32>, vector<32x4xf32>, vector<2x4xf32> -> vector<2x4xf32>
    %59 = arith.mulf %56, %51 : vector<2x32xf32>
    %cst_29 = arith.constant dense<0.000000e+00> : vector<2x4xf32>
    %60 = tpu.matmul %59, %48, %cst_29 {dimension_numbers = #tpu.dot_dimension_numbers<[1], [0], [0], [1], [0, 0, 1, 1], [], []>} : vector<2x32xf32>, vector<32x4xf32>, vector<2x4xf32> -> vector<2x4xf32>
    %61 = arith.mulf %56, %52 : vector<2x32xf32>
    %cst_30 = arith.constant dense<0.000000e+00> : vector<2x4xf32>
    %62 = tpu.matmul %61, %48, %cst_30 {dimension_numbers = #tpu.dot_dimension_numbers<[1], [0], [0], [1], [0, 0, 1, 1], [], []>} : vector<2x32xf32>, vector<32x4xf32>, vector<2x4xf32> -> vector<2x4xf32>
    %63 = arith.maximumf %58, %60 : vector<2x4xf32>
    %64 = arith.maximumf %63, %62 : vector<2x4xf32>
    %65 = arith.subf %58, %64 : vector<2x4xf32>
    %66 = math.exp %65 : vector<2x4xf32>
    %67 = arith.subf %60, %64 : vector<2x4xf32>
    %68 = math.exp %67 : vector<2x4xf32>
    %69 = arith.subf %62, %64 : vector<2x4xf32>
    %70 = math.exp %69 : vector<2x4xf32>
    %71 = arith.addf %66, %68 : vector<2x4xf32>
    %72 = arith.addf %71, %70 : vector<2x4xf32>
    %cst_31 = arith.constant 1.000000e+00 : f32
    %73 = vector.broadcast %cst_31 : f32 to vector<2x4xf32>
    %74 = arith.divf %73, %72 : vector<2x4xf32>
    %cst_32 = arith.constant 0.000000e+00 : f32
    %75 = vector.broadcast %cst_32 : f32 to vector<2x32xf32>
    %76 = arith.mulf %66, %74 : vector<2x4xf32>
    %cst_33 = arith.constant dense<0.000000e+00> : vector<2x32xf32>
    %77 = tpu.matmul %76, %49, %cst_33 {dimension_numbers = #tpu.dot_dimension_numbers<[1], [0], [0], [1], [0, 0, 1, 1], [], []>} : vector<2x4xf32>, vector<4x32xf32>, vector<2x32xf32> -> vector<2x32xf32>
    %78 = arith.mulf %77, %53 : vector<2x32xf32>
    %79 = arith.addf %75, %78 : vector<2x32xf32>
    %80 = arith.mulf %68, %74 : vector<2x4xf32>
    %cst_34 = arith.constant dense<0.000000e+00> : vector<2x32xf32>
    %81 = tpu.matmul %80, %49, %cst_34 {dimension_numbers = #tpu.dot_dimension_numbers<[1], [0], [0], [1], [0, 0, 1, 1], [], []>} : vector<2x4xf32>, vector<4x32xf32>, vector<2x32xf32> -> vector<2x32xf32>
    %82 = arith.mulf %81, %54 : vector<2x32xf32>
    %83 = arith.addf %79, %82 : vector<2x32xf32>
    %84 = arith.mulf %70, %74 : vector<2x4xf32>
    %cst_35 = arith.constant dense<0.000000e+00> : vector<2x32xf32>
    %85 = tpu.matmul %84, %49, %cst_35 {dimension_numbers = #tpu.dot_dimension_numbers<[1], [0], [0], [1], [0, 0, 1, 1], [], []>} : vector<2x4xf32>, vector<4x32xf32>, vector<2x32xf32> -> vector<2x32xf32>
    %86 = arith.mulf %85, %55 : vector<2x32xf32>
    %87 = arith.addf %83, %86 : vector<2x32xf32>
    %88 = vector.extract_strided_slice %35 {offsets = [2, 0], sizes = [2, 32], strides = [1, 1]} : vector<6x32xf32> to vector<2x32xf32>
    %89 = arith.mulf %88, %50 : vector<2x32xf32>
    %cst_36 = arith.constant dense<0.000000e+00> : vector<2x4xf32>
    %90 = tpu.matmul %89, %48, %cst_36 {dimension_numbers = #tpu.dot_dimension_numbers<[1], [0], [0], [1], [0, 0, 1, 1], [], []>} : vector<2x32xf32>, vector<32x4xf32>, vector<2x4xf32> -> vector<2x4xf32>
    %91 = arith.mulf %88, %51 : vector<2x32xf32>
    %cst_37 = arith.constant dense<0.000000e+00> : vector<2x4xf32>
    %92 = tpu.matmul %91, %48, %cst_37 {dimension_numbers = #tpu.dot_dimension_numbers<[1], [0], [0], [1], [0, 0, 1, 1], [], []>} : vector<2x32xf32>, vector<32x4xf32>, vector<2x4xf32> -> vector<2x4xf32>
    %93 = arith.mulf %88, %52 : vector<2x32xf32>
    %cst_38 = arith.constant dense<0.000000e+00> : vector<2x4xf32>
    %94 = tpu.matmul %93, %48, %cst_38 {dimension_numbers = #tpu.dot_dimension_numbers<[1], [0], [0], [1], [0, 0, 1, 1], [], []>} : vector<2x32xf32>, vector<32x4xf32>, vector<2x4xf32> -> vector<2x4xf32>
    %95 = arith.maximumf %90, %92 : vector<2x4xf32>
    %96 = arith.maximumf %95, %94 : vector<2x4xf32>
    %97 = arith.subf %90, %96 : vector<2x4xf32>
    %98 = math.exp %97 : vector<2x4xf32>
    %99 = arith.subf %92, %96 : vector<2x4xf32>
    %100 = math.exp %99 : vector<2x4xf32>
    %101 = arith.subf %94, %96 : vector<2x4xf32>
    %102 = math.exp %101 : vector<2x4xf32>
    %103 = arith.addf %98, %100 : vector<2x4xf32>
    %104 = arith.addf %103, %102 : vector<2x4xf32>
    %cst_39 = arith.constant 1.000000e+00 : f32
    %105 = vector.broadcast %cst_39 : f32 to vector<2x4xf32>
    %106 = arith.divf %105, %104 : vector<2x4xf32>
    %cst_40 = arith.constant 0.000000e+00 : f32
    %107 = vector.broadcast %cst_40 : f32 to vector<2x32xf32>
    %108 = arith.mulf %98, %106 : vector<2x4xf32>
    %cst_41 = arith.constant dense<0.000000e+00> : vector<2x32xf32>
    %109 = tpu.matmul %108, %49, %cst_41 {dimension_numbers = #tpu.dot_dimension_numbers<[1], [0], [0], [1], [0, 0, 1, 1], [], []>} : vector<2x4xf32>, vector<4x32xf32>, vector<2x32xf32> -> vector<2x32xf32>
    %110 = arith.mulf %109, %53 : vector<2x32xf32>
    %111 = arith.addf %107, %110 : vector<2x32xf32>
    %112 = arith.mulf %100, %106 : vector<2x4xf32>
    %cst_42 = arith.constant dense<0.000000e+00> : vector<2x32xf32>
    %113 = tpu.matmul %112, %49, %cst_42 {dimension_numbers = #tpu.dot_dimension_numbers<[1], [0], [0], [1], [0, 0, 1, 1], [], []>} : vector<2x4xf32>, vector<4x32xf32>, vector<2x32xf32> -> vector<2x32xf32>
    %114 = arith.mulf %113, %54 : vector<2x32xf32>
    %115 = arith.addf %111, %114 : vector<2x32xf32>
    %116 = arith.mulf %102, %106 : vector<2x4xf32>
    %cst_43 = arith.constant dense<0.000000e+00> : vector<2x32xf32>
    %117 = tpu.matmul %116, %49, %cst_43 {dimension_numbers = #tpu.dot_dimension_numbers<[1], [0], [0], [1], [0, 0, 1, 1], [], []>} : vector<2x4xf32>, vector<4x32xf32>, vector<2x32xf32> -> vector<2x32xf32>
    %118 = arith.mulf %117, %55 : vector<2x32xf32>
    %119 = arith.addf %115, %118 : vector<2x32xf32>
    %120 = vector.extract_strided_slice %35 {offsets = [4, 0], sizes = [2, 32], strides = [1, 1]} : vector<6x32xf32> to vector<2x32xf32>
    %121 = arith.mulf %120, %50 : vector<2x32xf32>
    %cst_44 = arith.constant dense<0.000000e+00> : vector<2x4xf32>
    %122 = tpu.matmul %121, %48, %cst_44 {dimension_numbers = #tpu.dot_dimension_numbers<[1], [0], [0], [1], [0, 0, 1, 1], [], []>} : vector<2x32xf32>, vector<32x4xf32>, vector<2x4xf32> -> vector<2x4xf32>
    %123 = arith.mulf %120, %51 : vector<2x32xf32>
    %cst_45 = arith.constant dense<0.000000e+00> : vector<2x4xf32>
    %124 = tpu.matmul %123, %48, %cst_45 {dimension_numbers = #tpu.dot_dimension_numbers<[1], [0], [0], [1], [0, 0, 1, 1], [], []>} : vector<2x32xf32>, vector<32x4xf32>, vector<2x4xf32> -> vector<2x4xf32>
    %125 = arith.mulf %120, %52 : vector<2x32xf32>
    %cst_46 = arith.constant dense<0.000000e+00> : vector<2x4xf32>
    %126 = tpu.matmul %125, %48, %cst_46 {dimension_numbers = #tpu.dot_dimension_numbers<[1], [0], [0], [1], [0, 0, 1, 1], [], []>} : vector<2x32xf32>, vector<32x4xf32>, vector<2x4xf32> -> vector<2x4xf32>
    %127 = arith.maximumf %122, %124 : vector<2x4xf32>
    %128 = arith.maximumf %127, %126 : vector<2x4xf32>
    %129 = arith.subf %122, %128 : vector<2x4xf32>
    %130 = math.exp %129 : vector<2x4xf32>
    %131 = arith.subf %124, %128 : vector<2x4xf32>
    %132 = math.exp %131 : vector<2x4xf32>
    %133 = arith.subf %126, %128 : vector<2x4xf32>
    %134 = math.exp %133 : vector<2x4xf32>
    %135 = arith.addf %130, %132 : vector<2x4xf32>
    %136 = arith.addf %135, %134 : vector<2x4xf32>
    %cst_47 = arith.constant 1.000000e+00 : f32
    %137 = vector.broadcast %cst_47 : f32 to vector<2x4xf32>
    %138 = arith.divf %137, %136 : vector<2x4xf32>
    %cst_48 = arith.constant 0.000000e+00 : f32
    %139 = vector.broadcast %cst_48 : f32 to vector<2x32xf32>
    %140 = arith.mulf %130, %138 : vector<2x4xf32>
    %cst_49 = arith.constant dense<0.000000e+00> : vector<2x32xf32>
    %141 = tpu.matmul %140, %49, %cst_49 {dimension_numbers = #tpu.dot_dimension_numbers<[1], [0], [0], [1], [0, 0, 1, 1], [], []>} : vector<2x4xf32>, vector<4x32xf32>, vector<2x32xf32> -> vector<2x32xf32>
    %142 = arith.mulf %141, %53 : vector<2x32xf32>
    %143 = arith.addf %139, %142 : vector<2x32xf32>
    %144 = arith.mulf %132, %138 : vector<2x4xf32>
    %cst_50 = arith.constant dense<0.000000e+00> : vector<2x32xf32>
    %145 = tpu.matmul %144, %49, %cst_50 {dimension_numbers = #tpu.dot_dimension_numbers<[1], [0], [0], [1], [0, 0, 1, 1], [], []>} : vector<2x4xf32>, vector<4x32xf32>, vector<2x32xf32> -> vector<2x32xf32>
    %146 = arith.mulf %145, %54 : vector<2x32xf32>
    %147 = arith.addf %143, %146 : vector<2x32xf32>
    %148 = arith.mulf %134, %138 : vector<2x4xf32>
    %cst_51 = arith.constant dense<0.000000e+00> : vector<2x32xf32>
    %149 = tpu.matmul %148, %49, %cst_51 {dimension_numbers = #tpu.dot_dimension_numbers<[1], [0], [0], [1], [0, 0, 1, 1], [], []>} : vector<2x4xf32>, vector<4x32xf32>, vector<2x32xf32> -> vector<2x32xf32>
    %150 = arith.mulf %149, %55 : vector<2x32xf32>
    %151 = arith.addf %147, %150 : vector<2x32xf32>
    %152 = tpu.concatenate %87, %119, %151 in 0 : vector<2x32xf32>, vector<2x32xf32>, vector<2x32xf32> -> vector<6x32xf32>
    %c0_52 = arith.constant 0 : index
    %c0_53 = arith.constant 0 : index
    %c0_54 = arith.constant 0 : index
    %153 = vector.load %arg15[%c0_52, %c0_53, %c0_54] : memref<1x32x32xf32, #tpu.memory_space<vmem>>, vector<1x32x32xf32>
    %154 = vector.shape_cast %153 : vector<1x32x32xf32> to vector<32x32xf32>
    %cst_55 = arith.constant dense<0.000000e+00> : vector<6x32xf32>
    %155 = tpu.matmul %152, %154, %cst_55 {dimension_numbers = #tpu.dot_dimension_numbers<[1], [0], [0], [1], [0, 0, 1, 1], [], []>} : vector<6x32xf32>, vector<32x32xf32>, vector<6x32xf32> -> vector<6x32xf32>
    %156 = arith.addf %3, %155 : vector<6x32xf32>
    %157 = vector.extract_strided_slice %7 {offsets = [3, 0], sizes = [1, 32], strides = [1, 1]} : vector<5x32xf32> to vector<1x32xf32>
    %158 = vector.broadcast %157 : vector<1x32xf32> to vector<6x32xf32>
    %159 = arith.addf %156, %158 : vector<6x32xf32>
    %160 = vector.extract_strided_slice %5 {offsets = [2, 0], sizes = [1, 32], strides = [1, 1]} : vector<4x32xf32> to vector<1x32xf32>
    %161 = vector.extract_strided_slice %5 {offsets = [3, 0], sizes = [1, 32], strides = [1, 1]} : vector<4x32xf32> to vector<1x32xf32>
    %cst_56 = arith.constant dense<0.000000e+00> : vector<6xf32>
    %162 = vector.multi_reduction <add>, %159, %cst_56 [1] : vector<6x32xf32> to vector<6xf32>
    %163 = vector.shape_cast %162 : vector<6xf32> to vector<6x1xf32>
    %cst_57 = arith.constant 3.200000e+01 : f32
    %164 = vector.broadcast %cst_57 : f32 to vector<6x1xf32>
    %165 = arith.divf %163, %164 : vector<6x1xf32>
    %166 = vector.broadcast %165 : vector<6x1xf32> to vector<6x32xf32>
    %167 = arith.subf %159, %166 : vector<6x32xf32>
    %168 = arith.mulf %167, %167 : vector<6x32xf32>
    %cst_58 = arith.constant dense<0.000000e+00> : vector<6xf32>
    %169 = vector.multi_reduction <add>, %168, %cst_58 [1] : vector<6x32xf32> to vector<6xf32>
    %170 = vector.shape_cast %169 : vector<6xf32> to vector<6x1xf32>
    %cst_59 = arith.constant 3.200000e+01 : f32
    %171 = vector.broadcast %cst_59 : f32 to vector<6x1xf32>
    %172 = arith.divf %170, %171 : vector<6x1xf32>
    %cst_60 = arith.constant 9.99999997E-7 : f32
    %173 = vector.broadcast %cst_60 : f32 to vector<6x1xf32>
    %174 = arith.addf %172, %173 : vector<6x1xf32>
    %175 = math.rsqrt %174 : vector<6x1xf32>
    %176 = vector.broadcast %175 : vector<6x1xf32> to vector<6x32xf32>
    %177 = arith.mulf %167, %176 : vector<6x32xf32>
    %178 = vector.broadcast %160 : vector<1x32xf32> to vector<6x32xf32>
    %179 = arith.mulf %177, %178 : vector<6x32xf32>
    %180 = vector.broadcast %161 : vector<1x32xf32> to vector<6x32xf32>
    %181 = arith.addf %179, %180 : vector<6x32xf32>
    %c0_61 = arith.constant 0 : index
    %c0_62 = arith.constant 0 : index
    %c0_63 = arith.constant 0 : index
    %182 = vector.load %arg16[%c0_61, %c0_62, %c0_63] : memref<1x32x128xf32, #tpu.memory_space<vmem>>, vector<1x32x128xf32>
    %183 = vector.shape_cast %182 : vector<1x32x128xf32> to vector<32x128xf32>
    %cst_64 = arith.constant dense<0.000000e+00> : vector<6x128xf32>
    %184 = tpu.matmul %181, %183, %cst_64 {dimension_numbers = #tpu.dot_dimension_numbers<[1], [0], [0], [1], [0, 0, 1, 1], [], []>} : vector<6x32xf32>, vector<32x128xf32>, vector<6x128xf32> -> vector<6x128xf32>
    %c0_65 = arith.constant 0 : index
    %c0_66 = arith.constant 0 : index
    %c0_67 = arith.constant 0 : index
    %185 = vector.load %arg19[%c0_65, %c0_66, %c0_67] : memref<1x1x128xf32, #tpu.memory_space<vmem>>, vector<1x1x128xf32>
    %186 = vector.shape_cast %185 : vector<1x1x128xf32> to vector<1x128xf32>
    %187 = vector.broadcast %186 : vector<1x128xf32> to vector<6x128xf32>
    %188 = arith.addf %184, %187 : vector<6x128xf32>
    %cst_68 = arith.constant 5.000000e-01 : f32
    %189 = vector.broadcast %cst_68 : f32 to vector<6x128xf32>
    %190 = arith.mulf %189, %188 : vector<6x128xf32>
    %cst_69 = arith.constant 0.707106769 : f32
    %191 = vector.broadcast %cst_69 : f32 to vector<6x128xf32>
    %192 = arith.mulf %188, %191 : vector<6x128xf32>
    %193 = math.erf %192 : vector<6x128xf32>
    %cst_70 = arith.constant 1.000000e+00 : f32
    %194 = vector.broadcast %cst_70 : f32 to vector<6x128xf32>
    %195 = arith.addf %194, %193 : vector<6x128xf32>
    %196 = arith.mulf %190, %195 : vector<6x128xf32>
    %c0_71 = arith.constant 0 : index
    %c0_72 = arith.constant 0 : index
    %c0_73 = arith.constant 0 : index
    %197 = vector.load %arg17[%c0_71, %c0_72, %c0_73] : memref<1x128x32xf32, #tpu.memory_space<vmem>>, vector<1x128x32xf32>
    %198 = vector.shape_cast %197 : vector<1x128x32xf32> to vector<128x32xf32>
    %cst_74 = arith.constant dense<0.000000e+00> : vector<6x32xf32>
    %199 = tpu.matmul %196, %198, %cst_74 {dimension_numbers = #tpu.dot_dimension_numbers<[1], [0], [0], [1], [0, 0, 1, 1], [], []>} : vector<6x128xf32>, vector<128x32xf32>, vector<6x32xf32> -> vector<6x32xf32>
    %200 = arith.addf %159, %199 : vector<6x32xf32>
    %201 = vector.extract_strided_slice %7 {offsets = [4, 0], sizes = [1, 32], strides = [1, 1]} : vector<5x32xf32> to vector<1x32xf32>
    %202 = vector.broadcast %201 : vector<1x32xf32> to vector<6x32xf32>
    %203 = arith.addf %200, %202 : vector<6x32xf32>
    %c0_75 = arith.constant 0 : index
    %c0_76 = arith.constant 0 : index
    %204 = vector.load %arg21[%c0_75, %c0_76] : memref<6x32xf32, #tpu.memory_space<vmem>>, vector<6x32xf32>
    tpu.vector_store %arg21[%c0_75, %c0_76], %203 {strides = array<i32>} : memref<6x32xf32, #tpu.memory_space<vmem>>, vector<6x32xf32>,
    %c1_i32 = arith.constant 1 : i32
    %205 = arith.cmpi eq, %arg1, %c1_i32 : i32
    %206 = arith.extui %205 : i1 to i32
    %c0_i32_77 = arith.constant 0 : i32
    %207 = arith.cmpi ne, %206, %c0_i32_77 : i32
    scf.if %207 {
      %208 = vector.extract_strided_slice %203 {offsets = [0, 0], sizes = [2, 32], strides = [1, 1]} : vector<6x32xf32> to vector<2x32xf32>
      %c0_78 = arith.constant 0 : index
      %c0_79 = arith.constant 0 : index
      %209 = vector.load %arg8[%c0_78, %c0_79] : memref<2x32xf32, #tpu.memory_space<vmem>>, vector<1x32xf32>
      %c1 = arith.constant 1 : index
      %c0_80 = arith.constant 0 : index
      %210 = vector.load %arg8[%c1, %c0_80] : memref<2x32xf32, #tpu.memory_space<vmem>>, vector<1x32xf32>
      %cst_81 = arith.constant dense<0.000000e+00> : vector<2xf32>
      %211 = vector.multi_reduction <add>, %208, %cst_81 [1] : vector<2x32xf32> to vector<2xf32>
      %212 = vector.shape_cast %211 : vector<2xf32> to vector<2x1xf32>
      %cst_82 = arith.constant 3.200000e+01 : f32
      %213 = vector.broadcast %cst_82 : f32 to vector<2x1xf32>
      %214 = arith.divf %212, %213 : vector<2x1xf32>
      %215 = vector.broadcast %214 : vector<2x1xf32> to vector<2x32xf32>
      %216 = arith.subf %208, %215 : vector<2x32xf32>
      %217 = arith.mulf %216, %216 : vector<2x32xf32>
      %cst_83 = arith.constant dense<0.000000e+00> : vector<2xf32>
      %218 = vector.multi_reduction <add>, %217, %cst_83 [1] : vector<2x32xf32> to vector<2xf32>
      %219 = vector.shape_cast %218 : vector<2xf32> to vector<2x1xf32>
      %cst_84 = arith.constant 3.200000e+01 : f32
      %220 = vector.broadcast %cst_84 : f32 to vector<2x1xf32>
      %221 = arith.divf %219, %220 : vector<2x1xf32>
      %cst_85 = arith.constant 9.99999997E-7 : f32
      %222 = vector.broadcast %cst_85 : f32 to vector<2x1xf32>
      %223 = arith.addf %221, %222 : vector<2x1xf32>
      %224 = math.rsqrt %223 : vector<2x1xf32>
      %225 = vector.broadcast %224 : vector<2x1xf32> to vector<2x32xf32>
      %226 = arith.mulf %216, %225 : vector<2x32xf32>
      %227 = vector.broadcast %209 : vector<1x32xf32> to vector<2x32xf32>
      %228 = arith.mulf %226, %227 : vector<2x32xf32>
      %229 = vector.broadcast %210 : vector<1x32xf32> to vector<2x32xf32>
      %230 = arith.addf %228, %229 : vector<2x32xf32>
      %c0_86 = arith.constant 0 : index
      %c0_87 = arith.constant 0 : index
      %231 = vector.load %arg9[%c0_86, %c0_87] : memref<32x1xf32, #tpu.memory_space<vmem>>, vector<32x1xf32>
      %cst_88 = arith.constant dense<0.000000e+00> : vector<2x1xf32>
      %232 = tpu.matmul %230, %231, %cst_88 {dimension_numbers = #tpu.dot_dimension_numbers<[1], [0], [0], [1], [0, 0, 1, 1], [], []>} : vector<2x32xf32>, vector<32x1xf32>, vector<2x1xf32> -> vector<2x1xf32>
      %c0_89 = arith.constant 0 : index
      %c0_90 = arith.constant 0 : index
      %233 = vector.load %arg10[%c0_89, %c0_90] : memref<1x1xf32, #tpu.memory_space<vmem>>, vector<1x1xf32>
      %234 = vector.broadcast %233 : vector<1x1xf32> to vector<2x1xf32>
      %235 = arith.addf %232, %234 : vector<2x1xf32>
      %c0_91 = arith.constant 0 : index
      %c0_92 = arith.constant 0 : index
      %236 = vector.load %arg20[%c0_91, %c0_92] : memref<2x1xf32, #tpu.memory_space<vmem>>, vector<2x1xf32>
      tpu.vector_store %arg20[%c0_91, %c0_92], %235 {strides = array<i32>} : memref<2x1xf32, #tpu.memory_space<vmem>>, vector<2x1xf32>,
    } else {
    }
    return
  }
  func.func @transform_0(%arg0: i32, %arg1: i32) -> (i32, i32, i32) {
    %c0_i32 = arith.constant 0 : i32
    %c0_i32_0 = arith.constant 0 : i32
    %c0_i32_1 = arith.constant 0 : i32
    return %c0_i32, %arg0, %c0_i32_0 : i32, i32, i32
  }
  func.func @transform_1(%arg0: i32, %arg1: i32) -> (i32, i32) {
    %c0_i32 = arith.constant 0 : i32
    %c0_i32_0 = arith.constant 0 : i32
    %c0_i32_1 = arith.constant 0 : i32
    return %c0_i32, %c0_i32_0 : i32, i32
  }
  func.func @transform_2(%arg0: i32, %arg1: i32) -> (i32, i32) {
    %c0_i32 = arith.constant 0 : i32
    %c0_i32_0 = arith.constant 0 : i32
    %c0_i32_1 = arith.constant 0 : i32
    return %c0_i32, %c0_i32_0 : i32, i32
  }
  func.func @transform_3(%arg0: i32, %arg1: i32) -> (i32, i32) {
    %c0_i32 = arith.constant 0 : i32
    %c0_i32_0 = arith.constant 0 : i32
    %c0_i32_1 = arith.constant 0 : i32
    return %c0_i32, %c0_i32_0 : i32, i32
  }
  func.func @transform_4(%arg0: i32, %arg1: i32) -> (i32, i32) {
    %c0_i32 = arith.constant 0 : i32
    %c0_i32_0 = arith.constant 0 : i32
    %c0_i32_1 = arith.constant 0 : i32
    return %c0_i32, %c0_i32_0 : i32, i32
  }
  func.func @transform_5(%arg0: i32, %arg1: i32) -> (i32, i32) {
    %c0_i32 = arith.constant 0 : i32
    %c0_i32_0 = arith.constant 0 : i32
    %c0_i32_1 = arith.constant 0 : i32
    return %c0_i32, %c0_i32_0 : i32, i32
  }
  func.func @transform_6(%arg0: i32, %arg1: i32) -> (i32, i32) {
    %c0_i32 = arith.constant 0 : i32
    %c0_i32_0 = arith.constant 0 : i32
    %c0_i32_1 = arith.constant 0 : i32
    return %c0_i32, %c0_i32_0 : i32, i32
  }
  func.func @transform_7(%arg0: i32, %arg1: i32) -> (i32, i32) {
    %c0_i32 = arith.constant 0 : i32
    %c0_i32_0 = arith.constant 0 : i32
    %c0_i32_1 = arith.constant 0 : i32
    return %c0_i32, %c0_i32_0 : i32, i32
  }
  func.func @transform_8(%arg0: i32, %arg1: i32) -> (i32, i32) {
    %c0_i32 = arith.constant 0 : i32
    %c0_i32_0 = arith.constant 0 : i32
    %c0_i32_1 = arith.constant 0 : i32
    return %c0_i32, %c0_i32_0 : i32, i32
  }
  func.func @transform_9(%arg0: i32, %arg1: i32) -> (i32, i32, i32) {
    %c0_i32 = arith.constant 0 : i32
    %c0_i32_0 = arith.constant 0 : i32
    %c0_i32_1 = arith.constant 0 : i32
    return %arg1, %c0_i32, %c0_i32_0 : i32, i32, i32
  }
  func.func @transform_10(%arg0: i32, %arg1: i32) -> (i32, i32, i32) {
    %c0_i32 = arith.constant 0 : i32
    %c0_i32_0 = arith.constant 0 : i32
    %c0_i32_1 = arith.constant 0 : i32
    return %arg1, %c0_i32, %c0_i32_0 : i32, i32, i32
  }
  func.func @transform_11(%arg0: i32, %arg1: i32) -> (i32, i32, i32) {
    %c0_i32 = arith.constant 0 : i32
    %c0_i32_0 = arith.constant 0 : i32
    %c0_i32_1 = arith.constant 0 : i32
    return %arg1, %c0_i32, %c0_i32_0 : i32, i32, i32
  }
  func.func @transform_12(%arg0: i32, %arg1: i32) -> (i32, i32, i32) {
    %c0_i32 = arith.constant 0 : i32
    %c0_i32_0 = arith.constant 0 : i32
    %c0_i32_1 = arith.constant 0 : i32
    return %arg1, %c0_i32, %c0_i32_0 : i32, i32, i32
  }
  func.func @transform_13(%arg0: i32, %arg1: i32) -> (i32, i32, i32) {
    %c0_i32 = arith.constant 0 : i32
    %c0_i32_0 = arith.constant 0 : i32
    %c0_i32_1 = arith.constant 0 : i32
    return %arg1, %c0_i32, %c0_i32_0 : i32, i32, i32
  }
  func.func @transform_14(%arg0: i32, %arg1: i32) -> (i32, i32, i32) {
    %c0_i32 = arith.constant 0 : i32
    %c0_i32_0 = arith.constant 0 : i32
    %c0_i32_1 = arith.constant 0 : i32
    return %arg1, %c0_i32, %c0_i32_0 : i32, i32, i32
  }
  func.func @transform_15(%arg0: i32, %arg1: i32) -> (i32, i32, i32) {
    %c0_i32 = arith.constant 0 : i32
    %c0_i32_0 = arith.constant 0 : i32
    %c0_i32_1 = arith.constant 0 : i32
    return %arg1, %c0_i32, %c0_i32_0 : i32, i32, i32
  }
  func.func @transform_16(%arg0: i32, %arg1: i32) -> (i32, i32, i32) {
    %c0_i32 = arith.constant 0 : i32
    %c0_i32_0 = arith.constant 0 : i32
    %c0_i32_1 = arith.constant 0 : i32
    return %arg1, %c0_i32, %c0_i32_0 : i32, i32, i32
  }
  func.func @transform_17(%arg0: i32, %arg1: i32) -> (i32, i32, i32) {
    %c0_i32 = arith.constant 0 : i32
    %c0_i32_0 = arith.constant 0 : i32
    %c0_i32_1 = arith.constant 0 : i32
    return %arg1, %c0_i32, %c0_i32_0 : i32, i32, i32
  }
  func.func @transform_18(%arg0: i32, %arg1: i32) -> (i32, i32) {
    %c0_i32 = arith.constant 0 : i32
    %c0_i32_0 = arith.constant 0 : i32
    return %arg0, %c0_i32 : i32, i32
  }
}

</mosaic_0001>

<bundles_post_ra>
// kernel: tpu_custom_call.1
= control target key start
LH: loop header
LB: loop body
LE: loop exit
PB: predicated region body
PF: predicated region fallthrough
CT: control target
= control target key end

     0   :  { %s3867_s29 = smov 0   ;;  %s3869_s30 = smov 0   ;;  %s4286_s0 = inlined_call_operand.vmem [shape: f32[2,2,16], index: 0, kind: input, shape index: {}]   ;;  %s4287_s1 = inlined_call_operand.vmem [shape: f32[16,32], index: 1, kind: input, shape index: {}]   ;;  %s4288_s2 = inlined_call_operand.vmem [shape: f32[1,32], index: 2, kind: input, shape index: {}]   ;;  %s4289_s3 = inlined_call_operand.vmem [shape: f32[1,32], index: 3, kind: input, shape index: {}]   ;;  %s4290_s4 = inlined_call_operand.vmem [shape: f32[32,4], index: 4, kind: input, shape index: {}]   ;;  %s4291_s5 = inlined_call_operand.vmem [shape: f32[4,32], index: 5, kind: input, shape index: {}]   ;;  %s4292_s6 = inlined_call_operand.vmem [shape: f32[2,32], index: 6, kind: input, shape index: {}]   ;;  %s4293_s7 = inlined_call_operand.vmem [shape: f32[32,1], index: 7, kind: input, shape index: {}]   ;;  %s4294_s8 = inlined_call_operand.<no memory space> [shape: f32[1,1], index: 8, kind: input, shape index: {}]   ;;  %s4295_s9 = inlined_call_operand.vmem [shape: f32[2,4,32], index: 9, kind: input, shape index: {}]   ;;  %s4296_s10 = inlined_call_operand.vmem [shape: f32[2,32,32], index: 10, kind: input, shape index: {}]   ;;  %s4297_s11 = inlined_call_operand.vmem [shape: f32[2,32,32], index: 11, kind: input, shape index: {}]   ;;  %s4298_s12 = inlined_call_operand.vmem [shape: f32[2,32,32], index: 12, kind: input, shape index: {}]   ;;  %s4299_s13 = inlined_call_operand.vmem [shape: f32[2,32,32], index: 13, kind: input, shape index: {}]   ;;  %s4300_s14 = inlined_call_operand.vmem [shape: f32[2,32,128], index: 14, kind: input, shape index: {}]   ;;  %s4301_s15 = inlined_call_operand.vmem [shape: f32[2,128,32], index: 15, kind: input, shape index: {}]   ;;  %s4302_s16 = inlined_call_operand.vmem [shape: f32[2,5,32], index: 16, kind: input, shape index: {}]   ;;  %s4303_s17 = inlined_call_operand.vmem [shape: f32[2,1,128], index: 17, kind: input, shape index: {}]   ;;  %s4304_s18 = inlined_call_operand.vmem [shape: f32[2,1], index: 18, kind: output, shape index: {}]  }
   0x1   :  { %4310 = sst [smem:[#allocation7_spill]] %s4286_s0  ;;  %v23_v0 = vstv %s4294_s8  ;;  %s3871_s0 = smov 0  }
   0x2   :  { %4311 = sst [smem:[#allocation8_spill]] %s4287_s1  ;;  %24 = vst [vmem:[#allocation3] sm:$0x1] %v23_v0 }
   0x3   :  { %4312 = sst [smem:[#allocation9_spill]] %s4288_s2 }
   0x4   :  { %4313 = sst [smem:[#allocation10_spill]] %s4292_s6 }
   0x5   :  { %4314 = sst [smem:[#allocation11_spill]] %s4295_s9 }
   0x6   :  { %4315 = sst [smem:[#allocation12_spill]] %s4296_s10 }
   0x7   :  { %4316 = sst [smem:[#allocation13_spill]] %s4297_s11 }
   0x8   :  { %4317 = sst [smem:[#allocation14_spill]] %s4298_s12 }
   0x9   :  { %4318 = sst [smem:[#allocation15_spill]] %s4299_s13 }
   0xa   :  { %4319 = sst [smem:[#allocation16_spill]] %s4304_s18 }
   0xb LB: > { %4320 = sst [smem:[#allocation4_spill]] %s3754_s30  ;;  %s39_s8 = sadd.s32 1, %s3754_s30  ;;  %s3758_s0 = sphi %s3871_s0, %s30_s0   ;;  %s3754_s30 = sphi %s3869_s30, %s4336_s30   ;;  %s3750_s29 = sphi %s3867_s29, %s4335_s29  }
   0xc   : > { %4321 = sst [smem:[#allocation5_spill]] %s3758_s0  ;;  %p3122_p0 = scmp.ge.s32.totalorder %s3758_s0, 1 }
   0xd   : > { %p40_p1 = scmp.ge.s32.totalorder %s39_s8, 2  ;;  %p611_p2 = scmp.lt.s32.totalorder %s3758_s0, 3 }
   0xf   : > { %s4338_s8 = smov (%p40_p1, %s39_s8), 0  ;;  %p612_p3 = pnand %p3122_p0, %p611_p2 }
  0x10   : > { %4322 = sst [smem:[#allocation6_spill]] %s4338_s8  ;;  %p708_p4 = scmp.lt.s32.totalorder (!%p612_p3), %s3750_s29, 1 }
  0x11   : > { %615 = sbr.rel (%p612_p3) target bundleno = 3312 (0xcf0), region = 92  ;;  %s4323_s9 = sld [smem:[#allocation11_spill]] (!%p612_p3) }
  0x12   : > { %s4324_s10 = sld [smem:[#allocation12_spill]] (!%p612_p3)  ;;  %s4325_s11 = sld [smem:[#allocation13_spill]] (!%p612_p3) }
  0x13   : > { %s4326_s12 = sld [smem:[#allocation14_spill]] (!%p612_p3)  ;;  %s4327_s13 = sld [smem:[#allocation15_spill]] (!%p612_p3) }
  0x14   : > { %p3137_p5 = scmp.ne.s32.totalorder (!%p612_p3), %s3750_s29, 0 }
  0x18   : > { %s3889_s19 = scalar_select %p708_p4, %s3750_s29, 1 }
  0x19   : > { %s4328_s22 = sld [smem:[#allocation8_spill]] (!%p3137_p5)  ;;  %v3760_v3 = vmov (!%p3137_p5), 0.0|0.0   ;;  %vm3761_vm0 = vmmov (!%p3137_p5), 0   ;;  %v3762_v5 = vmov (!%p3137_p5), 0.0   ;;  %s4329_s27 = sld [smem:[#allocation7_spill]] (!%p3137_p5)  ;;  %vm763_vm1 = vcmask (!%p3137_p5), 1041408  }
  0x1a   : > { %s3123_s1 = sshll.u32 %s3889_s19, 2  ;;  %s3183_s20 = sshll.u32 %s3889_s19, 5  ;;  %3554 = vmatprep.subr.bf16.mxu0 (!%p3137_p5), %v3760_v3  ;;  %3306 = vmatprep.mubr.msk.f32.mxu0 (!%p3137_p5), %vm3761_vm0, %v3762_v5  ;;  %vm774_vm2 = vcmask (!%p3137_p5), 130048   ;;  %v3141_v10 = vld [vmem:[%s4289_s3] ss:$0 sm:$0xff] (!%p3137_p5)  ;;  %vm855_vm3 = vcmask (!%p3137_p5), 254976  }
  0x1b   : > { %s3896_s2 = scalar_lea.vmem %s4323_s9, %s3123_s1  ;;  %s3901_s25 = scalar_lea.vmem %s4324_s10, %s3183_s20  ;;  %856 = vst.msk [vmem:[#allocation2] sm:$0x3] (!%p3137_p5), %vm855_vm3, %v3141_v10  ;;  %vm857_vm4 = vcmask (!%p3137_p5), 257024  }
  0x1c   : > { %s3906_s28 = scalar_lea.vmem %s4325_s11, %s3183_s20  ;;  %s3911_s0 = scalar_lea.vmem %s4326_s12, %s3183_s20 }
  0x1d   : > { %s3916_s1 = scalar_lea.vmem %s4327_s13, %s3183_s20  ;;  %s3921_s23 = scalar_lea.vmem %s4300_s14, %s3183_s20 }
  0x1e   : > { %s3188_s24 = sshll.u32 %s3889_s19, 7  ;;  %s3136_s9 = sshll.u32 %s3889_s19, 3 }
  0x1f   : > { %s3928_s10 = scalar_lea.vmem %s4301_s15, %s3188_s24  ;;  %s3933_s11 = scalar_lea.vmem %s4302_s16, %s3136_s9  ;;  %v765_v1 = vld [vmem:[%s4328_s22] sm:$0xff] (!%p3137_p5)  ;;  %v766_v2 = vld [vmem:[%s4328_s22 + $0x8] sm:$0xff] (!%p3137_p5) }
  0x20   : > { %s748_s12 = scalar_lea.vmem %s4303_s17, %s3889_s19  ;;  %756 = sbr.rel (%p3137_p5) target bundleno = 252 (0xfc), region = 96  ;;  %v3555_v4 = vpack.c.bf16 (!%p3137_p5), %v766_v2, %v765_v1  ;;  %v757_v6 = vld [vmem:[%s4329_s27] sm:$0x3] (!%p3137_p5)  ;;  %v3138_v7 = vld [vmem:[%s4329_s27 + $0x2] sm:$0x3] (!%p3137_p5) }
  0x21   : > { %v761_v8 = vrot.slane (!%p3137_p5), %v3138_v7, 6  ;;  %s4330_s21 = sld [smem:[#allocation9_spill]] (!%p3137_p5) }
  0x22   : > { %3556 = vmatpush3.bf16.msra.mxu0 (!%p3137_p5), %v3555_v4 }
  0x23   : > { %v764_v9 = vsel (!%p3137_p5), %vm763_vm1, %v757_v6, %v761_v8 }
  0x25   : > { %3307 = vmatmul.mubr.msk.f32.vlgmr.msra.gmra.mrb[0].mxu0 (!%p3137_p5), %vm774_vm2, %v764_v9 }
  0x27   : > { %v3139_v11 = vld [vmem:[%s4330_s21] ss:$0 sm:$0xff] }
  0xf8   : > { %v844_v12 = vpop.f32.mrb[0].mxu0 }
  0xf9   : > { %v845_v13 = vadd.f32 %v3139_v11, %v844_v12  ;;  %v3308_v14 = vpop.f32.mrb[1].mxu0 }
  0xfb   : > { %858 = vst.msk [vmem:[#allocation2 + $0x2] sm:$0xf] %vm857_vm4, %v845_v13 }
  0xfc PF: > { %vm862_vm5 = vcmask 259072   ;;  %v887_v22 = vld [vmem:[%s3901_s25] sm:$0xff]  ;;  %v888_v23 = vld [vmem:[%s3901_s25 + $0x8] sm:$0xff]  ;;  %v889_v24 = vld [vmem:[%s3901_s25 + $0x10] sm:$0xff]  ;;  %v3763_v25 = vmov 0.0|0.0   ;;  %vm3764_vm6 = vmmov 0   ;;  %v877_v32 = vlaneseq }
  0xfd   : > { %3557 = vmatprep.subr.bf16.mxu0 %v3763_v25  ;;  %v3558_v26 = vpack.c.bf16 %v888_v23, %v887_v22  ;;  %v890_v27 = vld [vmem:[%s3901_s25 + $0x18] sm:$0xff]  ;;  %v3765_v28 = vmov 0.0   ;;  %3587 = vmatprep.subr.bf16.mxu1 %v3763_v25  ;;  %v3980_v36 = vld [vmem:[%s3896_s2] sm:$0xf]  ;;  %v970_v43 = vld [vmem:[%s3906_s28 + $0x8] sm:$0xff]  ;;  %vm895_vm7 = vcmask 261120  }
  0xfe   : > { %3317 = vmatprep.mubr.msk.f32.mxu0 %vm3764_vm6, %v3765_v28  ;;  %3372 = vmatprep.mubr.msk.f32.mxu1 %vm3764_vm6, %v3765_v28  ;;  %v3561_v29 = vpack.c.bf16 %v890_v27, %v889_v24  ;;  %v3976_v34 = vshrl.u32 %v877_v32, 7  ;;  %v969_v42 = vld [vmem:[%s3906_s28] sm:$0xff]  ;;  %v971_v47 = vld [vmem:[%s3906_s28 + $0x10] sm:$0xff]  ;;  %v972_v48 = vld [vmem:[%s3906_s28 + $0x18] sm:$0xff]  ;;  %vm1377_vm8 = vcmask 1043456   ;;  %vm1373_vm9 = vcmask 31744  }
  0xff   : > { %3559 = vmatpush3.bf16.msra.mxu0 %v3558_v26  ;;  %v3564_v45 = vpack.c.bf16 %v970_v43, %v969_v42  ;;  %v3567_v49 = vpack.c.bf16 %v972_v48, %v971_v47  ;;  %v1047_v50 = vld [vmem:[%s3911_s0] sm:$0xff]  ;;  %v1048_v51 = vld [vmem:[%s3911_s0 + $0x8] sm:$0xff]  ;;  %v1049_v53 = vld [vmem:[%s3911_s0 + $0x10] sm:$0xff]  ;;  %vm2544_vm10 = vcmask 1041408   ;;  %p3175_p6 = scmp.ne.s32.totalorder %s3750_s29, 1 }
 0x100   : > { %3560 = vmatprep.subr.bf16.mxu0 %v3763_v25  ;;  %v879_v35 = vsub.s32 0, %v3976_v34  ;;  %v884_v37 = vsub.s32 1, %v3976_v34  ;;  %v3570_v52 = vpack.c.bf16 %v1048_v51, %v1047_v50  ;;  %v1050_v54 = vld [vmem:[%s3911_s0 + $0x18] sm:$0xff]  ;;  %v1125_v56 = vld [vmem:[%s4290_s4] sm:$0xff]  ;;  %v1126_v57 = vld [vmem:[%s4290_s4 + $0x8] sm:$0xff]  ;;  %v1053_v48 = vsub.s32 2, %v3976_v34 }
 0x101   : > { %v3573_v55 = vpack.c.bf16 %v1050_v54, %v1049_v53  ;;  %v4012_v58 = vpack.c.bf16 %v1126_v57, %v1125_v56  ;;  %v1127_v59 = vld [vmem:[%s4290_s4 + $0x10] sm:$0xff]  ;;  %v1128_v60 = vld [vmem:[%s4290_s4 + $0x18] sm:$0xff]  ;;  %v4031_v62 = vld [vmem:[%s3933_s11] sm:$0x1f]  ;;  %vm2841_vm11 = vcmask (!%p3175_p6), 254976   ;;  %vm3767_vm12 = vmmov (!%p3175_p6), 0  }
 0x102   : > { %v3958_v15 = vld [vmem:[#allocation2] sm:$0x3f]  ;;  %v880_v38 = vrot.slane %v3980_v36, %v879_v35  ;;  %v885_v41 = vrot.slane %v3980_v36, %v884_v37  ;;  %v4024_v61 = vpack.c.bf16 %v1128_v60, %v1127_v59  ;;  %v894_v63 = vrot.slane %v4031_v62, %v879_v35  ;;  %s4331_s0 = sld [smem:[#allocation10_spill]] (!%p3175_p6)  ;;  %s4333_s30 = sld [smem:[#allocation16_spill]] (!%p3175_p6) }
 0x103   : > { %v863_v16 = vsel %vm862_vm5, %v3958_v15, 0.0  ;;  %3562 = vmatpush3.bf16.msra.mxu0 %v3561_v29  ;;  %3589 = vmatpush3.bf16.msra.mxu1 %v4012_v58  ;;  %v976_v3 = vrot.slane %v4031_v62, %v884_v37  ;;  %vm2949_vm13 = vcmask (!%p3175_p6), 1024  }
 0x104   : > { %864 = vadd.xlane.f32.xlu0 %v863_v16  ;;  %3563 = vmatprep.subr.bf16.mxu0 %v3763_v25 }
 0x105   : > { %3590 = vmatprep.subr.bf16.mxu1 %v3763_v25 }
 0x107   : > { %3592 = vmatpush3.bf16.msra.mxu1 %v4024_v61 }
 0x108   : > { %3380 = vmatprep.subr.mxu1 %v3765_v28  ;;  %s4332_s25 = smov (!%p3175_p6), %s4331_s0 }
 0x191   : > { %v865_v17 = vpop.xlane.xlu0 %864 }
 0x192   : > { %v867_v18 = vmul.f32 0.03125, %v865_v17  ;;  %v4064_v17 = vld [vmem:[%s4291_s5] sm:$0xf] }
 0x194   : > { %v868_v19 = vsub.f32 %v3958_v15, %v867_v18 }
 0x196   : > { %v869_v20 = vmul.f32 %v868_v19, %v868_v19 }
 0x198   : > { %v870_v21 = vsel %vm862_vm5, %v869_v20, 0.0 }
 0x199   : > { %871 = vadd.xlane.f32.xlu0 %v870_v21 }
 0x226   : > { %v872_v30 = vpop.xlane.xlu0 %871 }
 0x227   : > { %v873_v31 = vmul.f32 0.03125, %v872_v30 }
 0x229   : > { %v874_v33 = vadd.f32 1e-06, %v873_v31 }
 0x22b   : > { %3704 = vrsqrt.f32 %v874_v33 }
 0x235   : > { %v3705_v39 = vpop.eup %3704 }
 0x236   : > { %v876_v40 = vmul.f32 %v3705_v39, %v868_v19 }
 0x238   : > { %v881_v44 = vmul.f32 %v880_v38, %v876_v40 }
 0x23a   : > { %v886_v46 = vadd.f32 %v885_v41, %v881_v44 }
 0x23c   : > { %3318 = vmatmul.mubr.msk.f32.vlgmr.msra.gmra.mrb[0].mxu0 %vm895_vm7, %v886_v46 }
 0x23d   : > { %3565 = vmatpush3.bf16.msra.mxu0 %v3564_v45  ;;  %3328 = vmatprep.mubr.msk.f32.mxu0 %vm3764_vm6, %v3765_v28 }
 0x23e   : > { %3566 = vmatprep.subr.bf16.mxu0 %v3763_v25 }
 0x241   : > { %3568 = vmatpush3.bf16.msra.mxu0 %v3567_v49  ;;  %v1054_v49 = vrot.slane %v4031_v62, %v1053_v48 }
 0x242   : > { %3569 = vmatprep.subr.bf16.mxu0 %v3763_v25 }
 0x244   : > { %3329 = vmatmul.mubr.msk.f32.vlgmr.msra.gmra.mrb[2].mxu0 %vm895_vm7, %v886_v46 }
 0x245   : > { %3571 = vmatpush3.bf16.msra.mxu0 %v3570_v52  ;;  %3339 = vmatprep.mubr.msk.f32.mxu0 %vm3764_vm6, %v3765_v28 }
 0x246   : > { %3572 = vmatprep.subr.bf16.mxu0 %v3763_v25 }
 0x249   : > { %3574 = vmatpush3.bf16.msra.mxu0 %v3573_v55 }
 0x24a   : > { %3575 = vmatprep.subr.bf16.mxu0 %v3763_v25 }
 0x24c   : > { %3340 = vmatmul.mubr.msk.f32.vlgmr.msra.gmra.mrb[4].mxu0 %vm895_vm7, %v886_v46 }
 0x24d   : > { %3350 = vmatprep.mubr.msk.f32.mxu0 %vm3764_vm6, %v3765_v28  ;;  %3577 = vmatpush3.bf16.msra.mxu0 %v4012_v58 }
 0x24e   : > { %3578 = vmatprep.subr.bf16.mxu0 %v3763_v25 }
 0x251   : > { %3580 = vmatpush3.bf16.msra.mxu0 %v4024_v61 }
 0x252   : > { %3581 = vmatprep.subr.bf16.mxu0 %v3763_v25 }
 0x30f   : > { %v965_v0 = vpop.f32.mrb[0].mxu0 }
 0x310   : > { %v966_v1 = vadd.f32 %v965_v0, %v894_v63  ;;  %v3319_v2 = vpop.f32.mrb[1].mxu0 }
 0x317   : > { %v1043_v4 = vpop.f32.mrb[2].mxu0 }
 0x318   : > { %v1044_v5 = vadd.f32 %v1043_v4, %v976_v3  ;;  %v3330_v6 = vpop.f32.mrb[3].mxu0 }
 0x31a   : > { %v4035_v7 = vmul.f32 %v1044_v5, %v966_v1  ;;  %v1205_v8 = vrot.slane %v1044_v5, 2  ;;  %v1281_v9 = vrot.slane %v1044_v5, 4  ;;  %v1610_v10 = vrot.slane %v1044_v5, 6 }
 0x31c   : > { %v4037_v11 = vmul.f32 %v1205_v8, %v966_v1  ;;  %v4039_v12 = vmul.f32 %v1610_v10, %v966_v1  ;;  %3351 = vmatmul.mubr.msk.f32.vlgmr.msra.gmra.mrb[6].mxu0 %vm895_vm7, %v4035_v7  ;;  %v4043_v13 = vmul.f32 %v1281_v9, %v966_v1  ;;  %v1687_v46 = vrot.slane %v4035_v7, 2 }
 0x31d   : > { %3583 = vmatpush3.bf16.msra.mxu0 %v4012_v58  ;;  %3361 = vmatprep.mubr.msk.f32.mxu0 %vm3764_vm6, %v3765_v28 }
 0x31e   : > { %3373 = vmatmul.mubr.msk.f32.vlgmr.msra.gmra.mrb[0].mxu1 %vm895_vm7, %v4043_v13  ;;  %3584 = vmatprep.subr.bf16.mxu0 %v3763_v25  ;;  %v1614_v45 = vrot.slane %v4039_v12, 2  ;;  %v1760_v47 = vrot.slane %v4037_v11, 2 }
 0x31f   : > { %v4051_v14 = vpop.f32.mrb[4].mxu0  ;;  %3382 = vmatprep.mubr.msk.f32.mxu1 %vm3764_vm6, %v3765_v28  ;;  %3381 = vmatpush3.msk.msra.mxu1 %vm1377_vm8, %v4064_v17 }
 0x320   : > { %v3341_v16 = vpop.f32.mrb[5].mxu0  ;;  %3593 = vmatprep.subr.bf16.mxu1 %v3763_v25  ;;  %v4119_v50 = vadd.f32 %v4051_v14, %v1054_v49 }
 0x321   : > { %3586 = vmatpush3.bf16.msra.mxu0 %v4024_v61 }
 0x322   : > { %3375 = vmatprep.subr.mxu0 %v3765_v28  ;;  %v4122_v51 = vrot.slane %v4119_v50, 2  ;;  %v4127_v60 = vrot.slane %v4119_v50, 4 }
 0x324   : > { %3362 = vmatmul.mubr.msk.f32.vlgmr.msra.gmra.mrb[8].mxu0 %vm895_vm7, %v4037_v11 }
 0x325   : > { %3377 = vmatprep.mubr.msk.f32.mxu0 %vm3764_vm6, %v3765_v28  ;;  %3376 = vmatpush3.msk.msra.mxu0 %vm1377_vm8, %v4064_v17 }
 0x326   : > { %3385 = vmatprep.subr.mxu0 %v3765_v28 }
 0x3ef   : > { %v1200_v18 = vpop.f32.mrb[6].mxu0 }
 0x3f0   : > { %v3352_v19 = vpop.f32.mrb[7].mxu0 }
 0x3f1   : > { %v1353_v20 = vpop.f32.mrb[0].mxu1 }
 0x3f2   : > { %v3374_v21 = vpop.f32.mrb[1].mxu1 }
 0x3f7   : > { %v1277_v22 = vpop.f32.mrb[8].mxu0 }
 0x3f8   : > { %v1357_v23 = vmax.f32 %v1200_v18, %v1277_v22  ;;  %v3363_v24 = vpop.f32.mrb[9].mxu0 }
 0x3fa   : > { %v1358_v26 = vmax.f32 %v1357_v23, %v1353_v20 }
 0x3fc   : > { %v1359_v27 = vsub.f32 %v1200_v18, %v1358_v26  ;;  %v1362_v29 = vsub.f32 %v1277_v22, %v1358_v26  ;;  %v1365_v30 = vsub.f32 %v1353_v20, %v1358_v26 }
 0x3fe   : > { %v1360_v31 = vmul.f32 1.442695, %v1359_v27  ;;  %v1363_v32 = vmul.f32 1.442695, %v1362_v29  ;;  %v1366_v33 = vmul.f32 1.442695, %v1365_v30 }
 0x400   : > { %3706 = vpow2.f32 %v1360_v31 }
 0x401   : > { %3708 = vpow2.f32 %v1363_v32 }
 0x402   : > { %3710 = vpow2.f32 %v1366_v33  ;;  %v2149_v33 = vrot.slane %v4039_v12, 4  ;;  %v2222_v12 = vrot.slane %v4035_v7, 4 }
 0x40a   : > { %v3707_v35 = vpop.eup %3706 }
 0x40b   : > { %v3709_v37 = vpop.eup %3708 }
 0x40c   : > { %v1368_v38 = vadd.f32 %v3709_v37, %v3707_v35  ;;  %v3711_v39 = vpop.eup %3710 }
 0x40e   : > { %v1369_v40 = vadd.f32 %v3711_v39, %v1368_v38 }
 0x410   : > { %3712 = vrcp.f32 %v1369_v40 }
 0x41a   : > { %v3713_v41 = vpop.eup %3712 }
 0x41b   : > { %v1372_v42 = vmul.f32 %v3713_v41, %v3707_v35  ;;  %v1453_v43 = vmul.f32 %v3713_v41, %v3709_v37  ;;  %v1532_v44 = vmul.f32 %v3713_v41, %v3711_v39  ;;  %v2076_v35 = vrot.slane %v4043_v13, 4 }
 0x41d   : > { %3378 = vmatmul.mubr.msk.f32.vlgmr.msra.gmra.mrb[10].mxu0 %vm1373_vm9, %v1372_v42  ;;  %3383 = vmatmul.mubr.msk.f32.vlgmr.msra.gmra.mrb[2].mxu1 %vm1373_vm9, %v1453_v43 }
 0x41e   : > { %3595 = vmatpush3.bf16.msra.mxu1 %v4012_v58  ;;  %3386 = vmatpush3.msk.msra.mxu0 %vm1377_vm8, %v4064_v17 }
 0x41f   : > { %3387 = vmatprep.mubr.msk.f32.mxu0 %vm3764_vm6, %v3765_v28  ;;  %3596 = vmatprep.subr.bf16.mxu1 %v3763_v25 }
 0x420   : > { %3599 = vmatprep.subr.bf16.mxu0 %v3763_v25  ;;  %3398 = vmatprep.mubr.msk.f32.mxu1 %vm3764_vm6, %v3765_v28 }
 0x421   : > { %3388 = vmatmul.mubr.msk.f32.vlgmr.msra.gmra.mrb[12].mxu0 %vm1373_vm9, %v1532_v44 }
 0x422   : > { %3598 = vmatpush3.bf16.msra.mxu1 %v4024_v61  ;;  %3601 = vmatpush3.bf16.msra.mxu0 %v4012_v58 }
 0x423   : > { %3602 = vmatprep.subr.bf16.mxu0 %v3763_v25  ;;  %3605 = vmatprep.subr.bf16.mxu1 %v3763_v25 }
 0x424   : > { %3409 = vmatprep.mubr.msk.f32.mxu0 %vm3764_vm6, %v3765_v28 }
 0x425   : > { %3399 = vmatmul.mubr.msk.f32.vlgmr.msra.gmra.mrb[4].mxu1 %vm895_vm7, %v1614_v45 }
 0x426   : > { %3604 = vmatpush3.bf16.msra.mxu0 %v4024_v61  ;;  %3607 = vmatpush3.bf16.msra.mxu1 %v4012_v58 }
 0x427   : > { %3608 = vmatprep.subr.bf16.mxu1 %v3763_v25  ;;  %3420 = vmatprep.mubr.msk.f32.mxu1 %vm3764_vm6, %v3765_v28 }
 0x428   : > { %3423 = vmatprep.subr.mxu0 %v3765_v28 }
 0x429   : > { %3410 = vmatmul.mubr.msk.f32.vlgmr.msra.gmra.mrb[14].mxu0 %vm895_vm7, %v1687_v46 }
 0x42a   : > { %3610 = vmatpush3.bf16.msra.mxu1 %v4024_v61  ;;  %3424 = vmatpush3.msk.msra.mxu0 %vm1377_vm8, %v4064_v17 }
 0x42b   : > { %3433 = vmatprep.subr.mxu1 %v3765_v28  ;;  %3425 = vmatprep.mubr.msk.f32.mxu0 %vm3764_vm6, %v3765_v28 }
 0x42c   : > { %3428 = vmatprep.subr.mxu0 %v3765_v28 }
 0x42d   : > { %3421 = vmatmul.mubr.msk.f32.vlgmr.msra.gmra.mrb[6].mxu1 %vm895_vm7, %v1760_v47 }
 0x42e   : > { %3434 = vmatpush3.msk.msra.mxu1 %vm1377_vm8, %v4064_v17  ;;  %3435 = vmatprep.mubr.msk.f32.mxu1 %vm3764_vm6, %v3765_v28 }
 0x42f   : > { %3617 = vmatprep.subr.bf16.mxu1 %v3763_v25 }
 0x4f0   : > { %v1447_v52 = vpop.f32.mrb[10].mxu0  ;;  %v1523_v53 = vpop.f32.mrb[2].mxu1 }
 0x4f1   : > { %v1451_v54 = vmul.f32 %v1447_v52, %v4119_v50  ;;  %v1530_v55 = vmul.f32 %v4122_v51, %v1523_v53  ;;  %v3379_v56 = vpop.f32.mrb[11].mxu0  ;;  %v3384_v57 = vpop.f32.mrb[3].mxu1 }
 0x4f3   : > { %v1531_v59 = vadd.f32 %v1530_v55, %v1451_v54 }
 0x4f4   : > { %v1602_v63 = vpop.f32.mrb[12].mxu0 }
 0x4f5   : > { %v1608_v0 = vmul.f32 %v4127_v60, %v1602_v63  ;;  %v3389_v1 = vpop.f32.mrb[13].mxu0 }
 0x4f7   : > { %v4130_v2 = vadd.f32 %v1608_v0, %v1531_v59 }
 0x4f8   : > { %v1683_v3 = vpop.f32.mrb[4].mxu1 }
 0x4f9   : > { %v3400_v4 = vpop.f32.mrb[5].mxu1 }
 0x4fc   : > { %v1756_v5 = vpop.f32.mrb[14].mxu0 }
 0x4fd   : > { %v1833_v6 = vmax.f32 %v1683_v3, %v1756_v5  ;;  %v3411_v8 = vpop.f32.mrb[15].mxu0 }
 0x500   : > { %v1829_v9 = vpop.f32.mrb[6].mxu1 }
 0x501   : > { %v1834_v10 = vmax.f32 %v1833_v6, %v1829_v9  ;;  %v3422_v11 = vpop.f32.mrb[7].mxu1 }
 0x503   : > { %v1835_v14 = vsub.f32 %v1683_v3, %v1834_v10  ;;  %v1838_v16 = vsub.f32 %v1756_v5, %v1834_v10  ;;  %v1841_v18 = vsub.f32 %v1829_v9, %v1834_v10 }
 0x505   : > { %v1836_v19 = vmul.f32 1.442695, %v1835_v14  ;;  %v1839_v20 = vmul.f32 1.442695, %v1838_v16  ;;  %v1842_v21 = vmul.f32 1.442695, %v1841_v18 }
 0x506   : > { %v2547_v16 = vld [vmem:[%s3916_s1] sm:$0xff]  ;;  %v2548_v18 = vld [vmem:[%s3916_s1 + $0x8] sm:$0xff] }
 0x507   : > { %3714 = vpow2.f32 %v1836_v19  ;;  %v3630_v19 = vpack.c.bf16 %v2548_v18, %v2547_v16  ;;  %v2753_v18 = vld [vmem:[%s3928_s10 + $0x58] sm:$0xff] }
 0x508   : > { %3716 = vpow2.f32 %v1839_v20  ;;  %v2550_v20 = vld [vmem:[%s3916_s1 + $0x18] sm:$0xff] }
 0x509   : > { %3718 = vpow2.f32 %v1842_v21 }
 0x511   : > { %v3715_v22 = vpop.eup %3714 }
 0x512   : > { %v3717_v23 = vpop.eup %3716 }
 0x513   : > { %v1844_v24 = vadd.f32 %v3717_v23, %v3715_v22  ;;  %v3719_v26 = vpop.eup %3718 }
 0x515   : > { %v1845_v27 = vadd.f32 %v3719_v26, %v1844_v24 }
 0x517   : > { %3720 = vrcp.f32 %v1845_v27 }
 0x521   : > { %v3721_v29 = vpop.eup %3720 }
 0x522   : > { %v1848_v30 = vmul.f32 %v3721_v29, %v3715_v22  ;;  %v2000_v31 = vmul.f32 %v3721_v29, %v3719_v26  ;;  %v1924_v32 = vmul.f32 %v3721_v29, %v3717_v23 }
 0x524   : > { %3426 = vmatmul.mubr.msk.f32.vlgmr.msra.gmra.mrb[16].mxu0 %vm1373_vm9, %v1848_v30  ;;  %3436 = vmatmul.mubr.msk.f32.vlgmr.msra.gmra.mrb[8].mxu1 %vm1373_vm9, %v2000_v31 }
 0x525   : > { %3429 = vmatpush3.msk.msra.mxu0 %vm1377_vm8, %v4064_v17  ;;  %3619 = vmatpush3.bf16.msra.mxu1 %v4012_v58 }
 0x526   : > { %3430 = vmatprep.mubr.msk.f32.mxu0 %vm3764_vm6, %v3765_v28  ;;  %3611 = vmatprep.subr.bf16.mxu0 %v3763_v25 }
 0x527   : > { %3620 = vmatprep.subr.bf16.mxu1 %v3763_v25  ;;  %3457 = vmatprep.mubr.msk.f32.mxu1 %vm3764_vm6, %v3765_v28 }
 0x528   : > { %3431 = vmatmul.mubr.msk.f32.vlgmr.msra.gmra.mrb[18].mxu0 %vm1373_vm9, %v1924_v32 }
 0x529   : > { %3613 = vmatpush3.bf16.msra.mxu0 %v4012_v58  ;;  %3622 = vmatpush3.bf16.msra.mxu1 %v4024_v61 }
 0x52a   : > { %3614 = vmatprep.subr.bf16.mxu0 %v3763_v25  ;;  %3446 = vmatprep.mubr.msk.f32.mxu0 %vm3764_vm6, %v3765_v28 }
 0x52b   : > { %3471 = vmatprep.subr.mxu1 %v3765_v28 }
 0x52c   : > { %3458 = vmatmul.mubr.msk.f32.vlgmr.msra.gmra.mrb[10].mxu1 %vm895_vm7, %v2149_v33 }
 0x52d   : > { %3616 = vmatpush3.bf16.msra.mxu0 %v4024_v61  ;;  %3472 = vmatpush3.msk.msra.mxu1 %vm1377_vm8, %v4064_v17 }
 0x52e   : > { %3623 = vmatprep.subr.bf16.mxu0 %v3763_v25  ;;  %3473 = vmatprep.mubr.msk.f32.mxu1 %vm3764_vm6, %v3765_v28 }
 0x52f   : > { %3476 = vmatprep.subr.mxu1 %v3765_v28 }
 0x530   : > { %3447 = vmatmul.mubr.msk.f32.vlgmr.msra.gmra.mrb[20].mxu0 %vm895_vm7, %v2076_v35 }
 0x531   : > { %3625 = vmatpush3.bf16.msra.mxu0 %v4012_v58  ;;  %3468 = vmatprep.mubr.msk.f32.mxu0 %vm3764_vm6, %v3765_v28 }
 0x532   : > { %3626 = vmatprep.subr.bf16.mxu0 %v3763_v25 }
 0x535   : > { %3628 = vmatpush3.bf16.msra.mxu0 %v4024_v61 }
 0x536   : > { %3481 = vmatprep.subr.mxu0 %v3765_v28 }
 0x538   : > { %3469 = vmatmul.mubr.msk.f32.vlgmr.msra.gmra.mrb[22].mxu0 %vm895_vm7, %v2222_v12 }
 0x539   : > { %3482 = vmatpush3.msk.msra.mxu0 %vm1377_vm8, %v4064_v17  ;;  %3483 = vmatprep.mubr.msk.f32.mxu0 %vm3764_vm6, %v3765_v28 }
 0x53a   : > { %3635 = vmatprep.subr.bf16.mxu0 %v3763_v25 }
 0x5f7   : > { %v1918_v58 = vpop.f32.mrb[16].mxu0  ;;  %v2070_v13 = vpop.f32.mrb[8].mxu1 }
 0x5f8   : > { %v1922_v37 = vmul.f32 %v1918_v58, %v4119_v50  ;;  %v2074_v61 = vmul.f32 %v2070_v13, %v4127_v60  ;;  %v3427_v38 = vpop.f32.mrb[17].mxu0  ;;  %v3437_v7 = vpop.f32.mrb[9].mxu1 }
 0x5fb   : > { %v1994_v39 = vpop.f32.mrb[18].mxu0 }
 0x5fc   : > { %v1998_v40 = vmul.f32 %v1994_v39, %v4122_v51  ;;  %v3432_v41 = vpop.f32.mrb[19].mxu0 }
 0x5fd   : > { %v2653_v41 = vld [vmem:[%s3921_s23] sm:$0xff] }
 0x5fe   : > { %v1999_v42 = vadd.f32 %v1998_v40, %v1922_v37 }
 0x5ff   : > { %v2218_v43 = vpop.f32.mrb[10].mxu1 }
 0x600   : > { %v2075_v44 = vadd.f32 %v2074_v61, %v1999_v42  ;;  %v3459_v45 = vpop.f32.mrb[11].mxu1  ;;  %v2654_v42 = vld [vmem:[%s3921_s23 + $0x8] sm:$0xff] }
 0x601   : > { %v2656_v45 = vld [vmem:[%s3921_s23 + $0x18] sm:$0xff] }
 0x602   : > { %v2539_v46 = vrot.slane %v2075_v44, 6  ;;  %v2655_v44 = vld [vmem:[%s3921_s23 + $0x10] sm:$0xff] }
 0x603   : > { %v2145_v47 = vpop.f32.mrb[20].mxu0 }
 0x604   : > { %v2295_v49 = vmax.f32 %v2145_v47, %v2218_v43  ;;  %v3448_v52 = vpop.f32.mrb[21].mxu0  ;;  %v2545_v53 = vsel %vm2544_vm10, %v4130_v2, %v2539_v46  ;;  %v3639_v46 = vpack.c.bf16 %v2656_v45, %v2655_v44 }
 0x605   : > { %v2744_v52 = vld [vmem:[%s3928_s10 + $0x10] sm:$0xff] }
 0x60b   : > { %v2291_v54 = vpop.f32.mrb[22].mxu0 }
 0x60c   : > { %v2296_v55 = vmax.f32 %v2295_v49, %v2291_v54  ;;  %v3470_v56 = vpop.f32.mrb[23].mxu0  ;;  %v2743_v49 = vld [vmem:[%s3928_s10 + $0x8] sm:$0xff] }
 0x60d   : > { %v2746_v56 = vld [vmem:[%s3928_s10 + $0x20] sm:$0xff] }
 0x60e   : > { %v2297_v57 = vsub.f32 %v2145_v47, %v2296_v55  ;;  %v2300_v59 = vsub.f32 %v2218_v43, %v2296_v55  ;;  %v2303_v63 = vsub.f32 %v2291_v54, %v2296_v55  ;;  %v3636_v43 = vpack.c.bf16 %v2654_v42, %v2653_v41  ;;  %v2742_v47 = vld [vmem:[%s3928_s10] sm:$0xff]  ;;  %v2745_v54 = vld [vmem:[%s3928_s10 + $0x18] sm:$0xff] }
 0x60f   : > { %v3645_v55 = vpack.c.bf16 %v2745_v54, %v2744_v52  ;;  %v2868_v42 = vld [vmem:[%s4293_s7 + $0x18] sm:$0xff] (!%p3175_p6)  ;;  %v3176_v52 = vld [vmem:[%s4331_s0] ss:$0 sm:$0xff] (!%p3175_p6)  ;;  %v3177_v54 = vld [vmem:[%s4332_s25 + $0x1] ss:$0 sm:$0xff] (!%p3175_p6) }
 0x610   : > { %v2298_v0 = vmul.f32 1.442695, %v2297_v57  ;;  %v2301_v1 = vmul.f32 1.442695, %v2300_v59  ;;  %v2304_v3 = vmul.f32 1.442695, %v2303_v63 }
 0x611   : > { %v2747_v57 = vld [vmem:[%s3928_s10 + $0x28] sm:$0xff] }
 0x612   : > { %3722 = vpow2.f32 %v2298_v0  ;;  %v3648_v59 = vpack.c.bf16 %v2747_v57, %v2746_v56  ;;  %v3178_v57 = vld [vmem:[#allocation3] ss:$0 sm:$0xff] (!%p3175_p6) }
 0x613   : > { %3724 = vpow2.f32 %v2301_v1 }
 0x614   : > { %3726 = vpow2.f32 %v2304_v3  ;;  %v2646_v3 = vrot.slane %v3980_v36, %v1053_v48  ;;  %v2750_v48 = vld [vmem:[%s3928_s10 + $0x40] sm:$0xff] }
 0x61c   : > { %v3723_v4 = vpop.eup %3722 }
 0x61d   : > { %v3725_v5 = vpop.eup %3724 }
 0x61e   : > { %v2306_v6 = vadd.f32 %v3725_v5, %v3723_v4  ;;  %v3727_v8 = vpop.eup %3726 }
 0x620   : > { %v2307_v9 = vadd.f32 %v3727_v8, %v2306_v6 }
 0x622   : > { %3728 = vrcp.f32 %v2307_v9 }
 0x62c   : > { %v3729_v2 = vpop.eup %3728 }
 0x62d   : > { %v2310_v10 = vmul.f32 %v3729_v2, %v3723_v4  ;;  %v2462_v11 = vmul.f32 %v3729_v2, %v3727_v8  ;;  %v2386_v14 = vmul.f32 %v3729_v2, %v3725_v5  ;;  %v2748_v2 = vld [vmem:[%s3928_s10 + $0x30] sm:$0xff] }
 0x62f   : > { %3474 = vmatmul.mubr.msk.f32.vlgmr.msra.gmra.mrb[12].mxu1 %vm1373_vm9, %v2310_v10  ;;  %3484 = vmatmul.mubr.msk.f32.vlgmr.msra.gmra.mrb[24].mxu0 %vm1373_vm9, %v2462_v11  ;;  %v2749_v10 = vld [vmem:[%s3928_s10 + $0x38] sm:$0xff] }
 0x630   : > { %3477 = vmatpush3.msk.msra.mxu1 %vm1377_vm8, %v4064_v17  ;;  %3478 = vmatprep.mubr.msk.f32.mxu1 %vm3764_vm6, %v3765_v28  ;;  %v2549_v17 = vld [vmem:[%s3916_s1 + $0x10] sm:$0xff]  ;;  %v3651_v11 = vpack.c.bf16 %v2749_v10, %v2748_v2 }
 0x631   : > { %3629 = vmatprep.subr.bf16.mxu1 %v3763_v25  ;;  %3505 = vmatprep.mubr.msk.f32.mxu0 %vm3764_vm6, %v3765_v28  ;;  %v3633_v21 = vpack.c.bf16 %v2550_v20, %v2549_v17  ;;  %v2754_v17 = vld [vmem:[%s3928_s10 + $0x60] sm:$0xff]  ;;  %v2755_v20 = vld [vmem:[%s3928_s10 + $0x68] sm:$0xff] }
 0x632   : > { %3637 = vmatpush3.bf16.msra.mxu0 %v3636_v43  ;;  %v3768_v43 = vmov (!%p3175_p6), 0.0  }
 0x633   : > { %3479 = vmatmul.mubr.msk.f32.vlgmr.msra.gmra.mrb[14].mxu1 %vm1373_vm9, %v2386_v14  ;;  %3638 = vmatprep.subr.bf16.mxu0 %v3763_v25  ;;  %v2751_v14 = vld [vmem:[%s3928_s10 + $0x48] sm:$0xff] }
 0x634   : > { %3494 = vmatprep.mubr.msk.f32.mxu1 %vm3764_vm6, %v3765_v28  ;;  %3631 = vmatpush3.bf16.msra.mxu1 %v3630_v19  ;;  %v3654_v16 = vpack.c.bf16 %v2751_v14, %v2750_v48 }
 0x635   : > { %3632 = vmatprep.subr.bf16.mxu1 %v3763_v25 }
 0x636   : > { %3640 = vmatpush3.bf16.msra.mxu0 %v3639_v46 }
 0x638   : > { %3634 = vmatpush3.bf16.msra.mxu1 %v3633_v21  ;;  %v3660_v21 = vpack.c.bf16 %v2755_v20, %v2754_v17 }
 0x639   : > { %3641 = vmatprep.subr.bf16.mxu1 %v3763_v25 }
 0x702   : > { %v2380_v22 = vpop.f32.mrb[12].mxu1  ;;  %v2532_v23 = vpop.f32.mrb[24].mxu0 }
 0x703   : > { %v2384_v24 = vmul.f32 %v2380_v22, %v4119_v50  ;;  %v2536_v26 = vmul.f32 %v2532_v23, %v4127_v60  ;;  %v3475_v27 = vpop.f32.mrb[13].mxu1  ;;  %v3485_v29 = vpop.f32.mrb[25].mxu0  ;;  %v2627_v50 = vsub.s32 3, %v3976_v34  ;;  %v2756_v22 = vld [vmem:[%s3928_s10 + $0x70] sm:$0xff]  ;;  %v2757_v23 = vld [vmem:[%s3928_s10 + $0x78] sm:$0xff] }
 0x705   : > { %v2628_v60 = vrot.slane %v4031_v62, %v2627_v50  ;;  %v2651_v5 = vrot.slane %v3980_v36, %v2627_v50  ;;  %v2752_v36 = vld [vmem:[%s3928_s10 + $0x50] sm:$0xff] }
 0x706   : > { %v2456_v30 = vpop.f32.mrb[14].mxu1  ;;  %v3657_v19 = vpack.c.bf16 %v2753_v18, %v2752_v36 }
 0x707   : > { %v2460_v31 = vmul.f32 %v2456_v30, %v4122_v51  ;;  %v3480_v32 = vpop.f32.mrb[15].mxu1 }
 0x709   : > { %v2461_v33 = vadd.f32 %v2460_v31, %v2384_v24  ;;  %v3663_v24 = vpack.c.bf16 %v2757_v23, %v2756_v22 }
 0x70b   : > { %v2537_v35 = vadd.f32 %v2536_v26, %v2461_v33  ;;  %v3173_v26 = vld [vmem:[%s748_s12] ss:$0 sm:$0xff] }
 0x70d   : > { %v2542_v12 = vrot.slane %v2537_v35, 4 }
 0x70f   : > { %v2546_v58 = vsel %vm1377_vm8, %v2545_v53, %v2542_v12  ;;  %v3642_v53 = vpack.c.bf16 %v2743_v49, %v2742_v47 }
 0x710   : > { %3495 = vmatmul.mubr.msk.f32.vlgmr.msra.gmra.mrb[16].mxu1 %vm895_vm7, %v2546_v58 }
 0x711   : > { %3540 = vmatprep.mubr.msk.f32.mxu1 %vm3764_vm6, %v3765_v28  ;;  %3643 = vmatpush3.bf16.msra.mxu1 %v3642_v53 }
 0x712   : > { %3644 = vmatprep.subr.bf16.mxu1 %v3763_v25 }
 0x715   : > { %3646 = vmatpush3.bf16.msra.mxu1 %v3645_v55 }
 0x716   : > { %3647 = vmatprep.subr.bf16.mxu1 %v3763_v25 }
 0x719   : > { %3649 = vmatpush3.bf16.msra.mxu1 %v3648_v59 }
 0x71a   : > { %3650 = vmatprep.subr.bf16.mxu1 %v3763_v25 }
 0x71d   : > { %3652 = vmatpush3.bf16.msra.mxu1 %v3651_v11 }
 0x71e   : > { %3653 = vmatprep.subr.bf16.mxu1 %v3763_v25 }
 0x721   : > { %3655 = vmatpush3.bf16.msra.mxu1 %v3654_v16 }
 0x722   : > { %3656 = vmatprep.subr.bf16.mxu1 %v3763_v25 }
 0x725   : > { %3658 = vmatpush3.bf16.msra.mxu1 %v3657_v19 }
 0x726   : > { %3659 = vmatprep.subr.bf16.mxu1 %v3763_v25 }
 0x729   : > { %3661 = vmatpush3.bf16.msra.mxu1 %v3660_v21 }
 0x72a   : > { %3662 = vmatprep.subr.bf16.mxu1 %v3763_v25  ;;  %v2831_v25 = vsub.s32 4, %v3976_v34 }
 0x72c   : > { %v2832_v58 = vrot.slane %v4031_v62, %v2831_v25  ;;  %v2865_v62 = vld [vmem:[%s4293_s7] sm:$0xff] (!%p3175_p6) }
 0x72d   : > { %3664 = vmatpush3.bf16.msra.mxu1 %v3663_v24 }
 0x7e3   : > { %v2620_v13 = vpop.f32.mrb[16].mxu1 }
 0x7e4   : > { %v2624_v51 = vadd.f32 %v2620_v13, %v3958_v15  ;;  %v3496_v37 = vpop.f32.mrb[17].mxu1 }
 0x7e6   : > { %v4206_v61 = vadd.f32 %v2628_v60, %v2624_v51 }
 0x7e8   : > { %v2630_v38 = vsel %vm862_vm5, %v4206_v61, 0.0 }
 0x7e9   : > { %2631 = vadd.xlane.f32.xlu1 %v2630_v38 }
 0x876   : > { %v2632_v7 = vpop.xlane.xlu1 %2631 }
 0x877   : > { %v2633_v28 = vmul.f32 0.03125, %v2632_v7 }
 0x879   : > { %v2634_v39 = vsub.f32 %v4206_v61, %v2633_v28 }
 0x87b   : > { %v2635_v40 = vmul.f32 %v2634_v39, %v2634_v39 }
 0x87d   : > { %v2636_v15 = vsel %vm862_vm5, %v2635_v40, 0.0  ;;  %v2867_v40 = vld [vmem:[%s4293_s7 + $0x10] sm:$0xff] (!%p3175_p6) }
 0x87e   : > { %2637 = vadd.xlane.f32.xlu1 %v2636_v15  ;;  %v3766_v15 = vmov (!%p3175_p6), 0.0|0.0   ;;  %v3669_v44 = vpack.c.bf16 (!%p3175_p6), %v2868_v42, %v2867_v40 }
 0x87f   : > { %3665 = vmatprep.subr.bf16.mxu0 (!%p3175_p6), %v3766_v15 }
 0x90b   : > { %v2638_v63 = vpop.xlane.xlu1 %2637 }
 0x90c   : > { %v2639_v0 = vmul.f32 0.03125, %v2638_v63 }
 0x90e   : > { %v2640_v1 = vadd.f32 1e-06, %v2639_v0 }
 0x910   : > { %3730 = vrsqrt.f32 %v2640_v1 }
 0x91a   : > { %v3731_v4 = vpop.eup %3730 }
 0x91b   : > { %v2642_v6 = vmul.f32 %v3731_v4, %v2634_v39 }
 0x91d   : > { %v2647_v8 = vmul.f32 %v2646_v3, %v2642_v6 }
 0x91f   : > { %v2652_v9 = vadd.f32 %v2651_v5, %v2647_v8 }
 0x921   : > { %3506 = vmatmul.mubr.msk.f32.vlgmr.msra.gmra.mrb[26].mxu0 %vm895_vm7, %v2652_v9 }
 0x922   : > { %3551 = vmatprep.mubr.msk.f32.mxu0 (!%p3175_p6), %vm3767_vm12, %v3768_v43 }
 0x9f4   : > { %v2733_v27 = vpop.f32.mrb[26].mxu0 }
 0x9f5   : > { %v2734_v29 = vadd.f32 %v3173_v26, %v2733_v27  ;;  %v3507_v30 = vpop.f32.mrb[27].mxu0 }
 0x9f7   : > { %v2738_v31 = vmul.f32 0.70710677, %v2734_v29  ;;  %v2737_v33 = vmul.f32 0.5, %v2734_v29 }
 0x9f9   : > { %3732 = verf.f32 %v2738_v31 }
 0xa03   : > { %v3733_v32 = vpop.eup %3732 }
 0xa04   : > { %v2740_v35 = vadd.f32 1.0, %v3733_v32 }
 0xa06   : > { %v2741_v12 = vmul.f32 %v2740_v35, %v2737_v33 }
 0xa08   : > { %3541 = vmatmul.mubr.f32.vlgmr.msra.gmra.mrb[18].mxu1 %v2741_v12 }
 0xada   : > { %2838 = sbr.rel (%p3175_p6) target bundleno = 3312 (0xcf0), region = 100 }
 0xadb   : > { %v2824_v50 = vpop.f32.mrb[18].mxu1 }
 0xadc   : > { %v2828_v60 = vadd.f32 %v2824_v50, %v4206_v61  ;;  %v3542_v13 = vpop.f32.mrb[19].mxu1  ;;  %v2866_v61 = vld [vmem:[%s4293_s7 + $0x8] sm:$0xff] (!%p3175_p6) }
 0xadd   : > { %v3666_v41 = vpack.c.bf16 (!%p3175_p6), %v2866_v61, %v2865_v62 }
 0xade   : > { %v2833_v51 = vadd.f32 %v2832_v58, %v2828_v60 }
 0xadf   : > { %3667 = vmatpush3.bf16.msra.mxu0 (!%p3175_p6), %v3666_v41 }
 0xae0   : > { %2834 = vst.msk [vmem:[#allocation2] sm:$0x3f] %vm862_vm5, %v2833_v51  ;;  %v2842_v37 = vsel (!%p3175_p6), %vm2841_vm11, %v2833_v51, 0.0  ;;  %3668 = vmatprep.subr.bf16.mxu0 (!%p3175_p6), %v3766_v15 }
 0xae1   : > { %2843 = vadd.xlane.f32.xlu0 %v2842_v37 }
 0xae3   : > { %3670 = vmatpush3.bf16.msra.mxu0 %v3669_v44 }
 0xb6e   : > { %v2844_v38 = vpop.xlane.xlu0 %2843 }
 0xb6f   : > { %v2845_v7 = vmul.f32 0.03125, %v2844_v38 }
 0xb71   : > { %v2846_v28 = vsub.f32 %v2833_v51, %v2845_v7 }
 0xb73   : > { %v2847_v39 = vmul.f32 %v2846_v28, %v2846_v28 }
 0xb75   : > { %v2848_v34 = vsel %vm2841_vm11, %v2847_v39, 0.0 }
 0xb76   : > { %2849 = vadd.xlane.f32.xlu0 %v2848_v34 }
 0xc03   : > { %v2850_v45 = vpop.xlane.xlu0 %2849 }
 0xc04   : > { %v2851_v46 = vmul.f32 0.03125, %v2850_v45 }
 0xc06   : > { %v2852_v47 = vadd.f32 1e-06, %v2851_v46 }
 0xc08   : > { %3734 = vrsqrt.f32 %v2852_v47 }
 0xc12   : > { %v3735_v49 = vpop.eup %3734 }
 0xc13   : > { %v2854_v53 = vmul.f32 %v3735_v49, %v2846_v28 }
 0xc15   : > { %v2859_v55 = vmul.f32 %v3176_v52, %v2854_v53 }
 0xc17   : > { %v2864_v56 = vadd.f32 %v3177_v54, %v2859_v55 }
 0xc19   : > { %3552 = vmatmul.mubr.msk.f32.vlgmr.msra.gmra.mrb[0].mxu0 %vm895_vm7, %v2864_v56 }
 0xcec   : > { %v2945_v59 = vpop.f32.mrb[0].mxu0 }
 0xced   : > { %v2946_v63 = vadd.f32 %v3178_v57, %v2945_v59  ;;  %v3553_v0 = vpop.f32.mrb[1].mxu0 }
 0xcef   : > { %2950 = vst.msk [vmem:[%s4333_s30] sm:$0x3] %vm2949_vm13, %v2946_v63 }
 0xcf0 PF: > { %s4334_s11 = sld [smem:[#allocation5_spill]]  ;;  %s4335_s29 = sld [smem:[#allocation4_spill]] }
 0xcf1   : > { %s4336_s30 = sld [smem:[#allocation6_spill]] }
 0xcf6   : > { %s30_s0 = sadd.s32 1, %s4334_s11  }
 0xcf7   : > { %p27_p7 = scmp.ge.s32.totalorder %s30_s0, 4  }
 0xcf9   :  { %29 = sbr.rel (!%p27_p7) target bundleno = 11 (0xb), region = 158 }

</bundles_post_ra>
